<compile_context>
chip_gen: v7x
topology: tpu7x:2x2x1
jax: 0.10.0
libtpu: 0.0.40
codegen_flags: <defaults>
</compile_context>

<pallas_src>
import functools

import jax
import jax.numpy as jnp
from jax.experimental import pallas as pl
from jax.experimental.pallas import tpu as pltpu


def _lstm_ae_kernel(x_ref,                      # (B, T, I)
                    wxe_ref, whe_ref, be_ref,   # encoder: (I,4H), (H,4H), (1,4H)
                    wxd_ref, whd_ref, bd_ref,   # decoder: (H,4H), (H,4H), (1,4H)
                    wr_ref, br_ref,             # reconstruct: (H,I), (1,I)
                    out_ref,                    # (B, T, I)
                    hs_ref,                     # VMEM scratch (B*T, H) f32
                    *, T, B, H):
    f32, bf16 = jnp.float32, jnp.bfloat16
    I = x_ref.shape[-1]

    # ---- hoisted loop-invariant loads / casts / fusions ----
    whe = whe_ref[...].astype(bf16)                        # recurrent enc weight
    wd = (wxd_ref[...] + whd_ref[...]).astype(bf16)        # dec input == prev h
    wr = wr_ref[...].astype(bf16)
    bd = jnp.broadcast_to(bd_ref[...], (B, 4 * H))         # broadcast once
    br = br_ref[...]

    lane = jax.lax.broadcasted_iota(jnp.int32, (B, 4 * H), 1)
    sig_mask = lane < 3 * H                                # [f,i,o]=sigmoid, [c]=tanh

    # ---- batched encoder input projection: one MXU pass over all timesteps.
    # (B,T,I) -> (B*T,I) just collapses (b,t) onto sublanes (row = b*T + t).
    x2 = x_ref[...].reshape(B * T, I).astype(bf16)
    gxb = jnp.dot(x2, wxe_ref[...].astype(bf16),
                  preferred_element_type=f32) + be_ref[...]   # (B*T, 4H)

    def step(g, c, ct):
        """Custom LSTM cell: c_next uses the PREVIOUS step's candidate ct."""
        act = jnp.where(sig_mask, jax.nn.sigmoid(g), jnp.tanh(g))  # 2 EUP pushes
        f = act[:, 0 * H:1 * H]
        i = act[:, 1 * H:2 * H]
        o = act[:, 2 * H:3 * H]
        cbar = act[:, 3 * H:4 * H]
        c_new = f * c + i * ct
        h_new = o * jnp.tanh(c_new)
        return h_new, c_new, cbar

    h = jnp.zeros((B, H), f32)
    c = jnp.zeros((B, H), f32)
    ct = jnp.zeros((B, H), f32)                            # init_hidden: zeros

    # ---- encoder recurrence (fully unrolled; T static & small) ----
    # TODO(synk): switch to lax.fori_loop(..., unroll=True) if T grows past ~16.
    for t in range(T):
        gx_t = jnp.concatenate(
            [gxb[b * T + t:b * T + t + 1, :] for b in range(B)], axis=0)
        if t == 0:
            g = gx_t                                       # h == 0: skip the dot
        else:
            g = gx_t + jnp.dot(h.astype(bf16), whe, preferred_element_type=f32)
        h, c, ct = step(g, c, ct)

    # ---- decoder recurrence (input == prev hidden -> single fused dot) ----
    for t in range(T):
        g = jnp.dot(h.astype(bf16), wd, preferred_element_type=f32) + bd
        h, c, ct = step(g, c, ct)
        for b in range(B):                                 # batch-major scratch
            hs_ref[b * T + t:b * T + t + 1, :] = h[b:b + 1, :]

    # ---- batched reconstruction: one matmul + one contiguous (B,T,I) store.
    # (I = 16 < 128 lanes -> masked store; noise at this size.)
    y = jnp.dot(hs_ref[...].astype(bf16), wr, preferred_element_type=f32) + br
    out_ref[...] = y.reshape(B, T, I).astype(out_ref.dtype)


def lstm_autoencoder(x, params):
    """x: (B, T, I) float32 -> reconstructed (B, T, I) float32.

    Single pallas_call with no surrounding layout HLOs: the kernel consumes
    x as-is and produces the output already in (B, T, I) order.
    """
    B, T, I = x.shape
    H = params["wh_enc"].shape[0]
    kernel = functools.partial(_lstm_ae_kernel, T=T, B=B, H=H)

    # TODO(synk): for real batch sizes, add a leading batch-tile grid axis
    # (blocks of >=8 rows) with dimension_semantics=("parallel","arbitrary")
    # so v7x's second TensorCore is used; pointless at B=2 (single tile).
    # VMEM footprint is tens of KiB — far under any scoped VMEM default.
    return pl.pallas_call(
        kernel,
        out_shape=jax.ShapeDtypeStruct((B, T, I), jnp.float32),
        grid=(1,),
        in_specs=[
            pl.BlockSpec((B, T, I), lambda i: (0, 0, 0)),    # x
            pl.BlockSpec((I, 4 * H), lambda i: (0, 0)),      # Wx_enc
            pl.BlockSpec((H, 4 * H), lambda i: (0, 0)),      # Wh_enc
            pl.BlockSpec((1, 4 * H), lambda i: (0, 0)),      # b_enc (folded)
            pl.BlockSpec((H, 4 * H), lambda i: (0, 0)),      # Wx_dec
            pl.BlockSpec((H, 4 * H), lambda i: (0, 0)),      # Wh_dec
            pl.BlockSpec((1, 4 * H), lambda i: (0, 0)),      # b_dec (folded)
            pl.BlockSpec((H, I), lambda i: (0, 0)),          # W_rec
            pl.BlockSpec((1, I), lambda i: (0, 0)),          # b_rec
        ],
        out_specs=pl.BlockSpec((B, T, I), lambda i: (0, 0, 0)),
        scratch_shapes=[pltpu.VMEM((B * T, H), jnp.float32)],
        compiler_params=pltpu.CompilerParams(
            dimension_semantics=("arbitrary",)),
    )(x,
      params["wx_enc"], params["wh_enc"], params["b_enc"],
      params["wx_dec"], params["wh_dec"], params["b_dec"],
      params["w_rec"], params["b_rec"])


def make_params(key, input_size, hidden_size):
    """Deterministic synthetic parameters, gate order [f, i, o, c].
    Per-gate biases fold W_*.bias + V_*.bias + b_* ; b_f contributes +1.0."""
    H, I = hidden_size, input_size
    ks = jax.random.split(key, 8)

    def u(k, shape, fan_in, fan_out):
        lim = (6.0 / (fan_in + fan_out)) ** 0.5
        return jax.random.uniform(k, shape, jnp.float32, -lim, lim)

    wx_enc = u(ks[0], (I, 4 * H), I, H)
    wh_enc = u(ks[1], (H, 4 * H), H, H)
    wx_dec = u(ks[2], (H, 4 * H), H, H)
    wh_dec = u(ks[3], (H, 4 * H), H, H)
    w_rec = u(ks[4], (H, I), H, I)

    b_enc = 0.05 * jax.random.normal(ks[5], (1, 4 * H), jnp.float32)
    b_enc = b_enc.at[:, :H].add(1.0)             # b_f = ones
    b_dec = 0.05 * jax.random.normal(ks[6], (1, 4 * H), jnp.float32)
    b_dec = b_dec.at[:, :H].add(1.0)             # b_f = ones
    b_rec = 0.05 * jax.random.normal(ks[7], (1, I), jnp.float32)

    return dict(wx_enc=wx_enc, wh_enc=wh_enc, b_enc=b_enc,
                wx_dec=wx_dec, wh_dec=wh_dec, b_dec=b_dec,
                w_rec=w_rec, b_rec=b_rec)


def reference(x, params):
    """Pure-JAX f32 reference mirroring the PyTorch forward (unfused decoder)."""
    B, T, I = x.shape
    H = params["wh_enc"].shape[0]

    def cell(xt, h, c, ct, wx, wh, b):
        g = xt @ wx + h @ wh + b
        f = jax.nn.sigmoid(g[:, :H])
        i = jax.nn.sigmoid(g[:, H:2 * H])
        o = jax.nn.sigmoid(g[:, 2 * H:3 * H])
        cbar = jnp.tanh(g[:, 3 * H:])
        c_new = f * c + i * ct
        h_new = o * jnp.tanh(c_new)
        return h_new, c_new, cbar

    h = c = ct = jnp.zeros((B, H), jnp.float32)
    for t in range(T):
        h, c, ct = cell(x[:, t, :], h, c, ct,
                        params["wx_enc"], params["wh_enc"], params["b_enc"])
    outs = []
    dec_in = h
    for t in range(T):
        h, c, ct = cell(dec_in, h, c, ct,
                        params["wx_dec"], params["wh_dec"], params["b_dec"])
        outs.append(h @ params["w_rec"] + params["b_rec"])
        dec_in = h
    return jnp.stack(outs, axis=1)


if __name__ == "__main__":
    batch, seq_len, input_size, hidden_size = 2, 8, 16, 32

    key = jax.random.PRNGKey(0)
    kx, kp = jax.random.split(key)
    x = jax.random.normal(kx, (batch, seq_len, input_size), jnp.float32)
    params = make_params(kp, input_size, hidden_size)

    out = lstm_autoencoder(x, params)
    out = jax.block_until_ready(out)

    ref = reference(x, params)
    assert out.shape == (batch, seq_len, input_size)
    # bf16 MXU operands (f32 accumulation) through a 16-step recurrence:
    # tolerance relaxed accordingly (semantics unchanged).
    assert jnp.allclose(out, ref, atol=5e-2, rtol=5e-2), "mismatch vs reference"

    print("KERNEL_OK")
</pallas_src>

<mosaic_0001>
module attributes {stable_mosaic.version = 11 : i64} {
  func.func @_lstm_ae_kernel(%arg0: i32, %arg1: memref<2x8x16xf32, #tpu.memory_space<vmem>>, %arg2: memref<16x128xf32, #tpu.memory_space<vmem>>, %arg3: memref<32x128xf32, #tpu.memory_space<vmem>>, %arg4: memref<1x128xf32, #tpu.memory_space<vmem>>, %arg5: memref<32x128xf32, #tpu.memory_space<vmem>>, %arg6: memref<32x128xf32, #tpu.memory_space<vmem>>, %arg7: memref<1x128xf32, #tpu.memory_space<vmem>>, %arg8: memref<32x16xf32, #tpu.memory_space<vmem>>, %arg9: memref<1x16xf32, #tpu.memory_space<vmem>>, %arg10: memref<2x8x16xf32, #tpu.memory_space<vmem>>, %arg11: memref<16x32xf32, #tpu.memory_space<vmem>>) attributes {dimension_semantics = [#tpu.dimension_semantics<arbitrary>], iteration_bounds = array<i64: 1>, scalar_prefetch = 0 : i64, scratch_operands = 1 : i64, tpu.core_type = #tpu.core_type<tc>, window_params = [{pipeline_mode = #tpu.pipeline_mode<synchronous>, transform_indices = @transform_0, window_bounds = array<i64: 2, 8, 16>}, {pipeline_mode = #tpu.pipeline_mode<synchronous>, transform_indices = @transform_1, window_bounds = array<i64: 16, 128>}, {pipeline_mode = #tpu.pipeline_mode<synchronous>, transform_indices = @transform_2, window_bounds = array<i64: 32, 128>}, {pipeline_mode = #tpu.pipeline_mode<synchronous>, transform_indices = @transform_3, window_bounds = array<i64: 1, 128>}, {pipeline_mode = #tpu.pipeline_mode<synchronous>, transform_indices = @transform_4, window_bounds = array<i64: 32, 128>}, {pipeline_mode = #tpu.pipeline_mode<synchronous>, transform_indices = @transform_5, window_bounds = array<i64: 32, 128>}, {pipeline_mode = #tpu.pipeline_mode<synchronous>, transform_indices = @transform_6, window_bounds = array<i64: 1, 128>}, {pipeline_mode = #tpu.pipeline_mode<synchronous>, transform_indices = @transform_7, window_bounds = array<i64: 32, 16>}, {pipeline_mode = #tpu.pipeline_mode<synchronous>, transform_indices = @transform_8, window_bounds = array<i64: 1, 16>}, {pipeline_mode = #tpu.pipeline_mode<synchronous>, transform_indices = @transform_9, window_bounds = array<i64: 2, 8, 16>}]} {
    %c0 = arith.constant 0 : index
    %c0_0 = arith.constant 0 : index
    %0 = vector.load %arg3[%c0, %c0_0] : memref<32x128xf32, #tpu.memory_space<vmem>>, vector<32x128xf32>
    %1 = arith.truncf %0 : vector<32x128xf32> to vector<32x128xbf16>
    %c0_1 = arith.constant 0 : index
    %c0_2 = arith.constant 0 : index
    %2 = vector.load %arg5[%c0_1, %c0_2] : memref<32x128xf32, #tpu.memory_space<vmem>>, vector<32x128xf32>
    %c0_3 = arith.constant 0 : index
    %c0_4 = arith.constant 0 : index
    %3 = vector.load %arg6[%c0_3, %c0_4] : memref<32x128xf32, #tpu.memory_space<vmem>>, vector<32x128xf32>
    %4 = arith.addf %2, %3 : vector<32x128xf32>
    %5 = arith.truncf %4 : vector<32x128xf32> to vector<32x128xbf16>
    %c0_5 = arith.constant 0 : index
    %c0_6 = arith.constant 0 : index
    %6 = vector.load %arg8[%c0_5, %c0_6] : memref<32x16xf32, #tpu.memory_space<vmem>>, vector<32x16xf32>
    %7 = arith.truncf %6 : vector<32x16xf32> to vector<32x16xbf16>
    %c0_7 = arith.constant 0 : index
    %c0_8 = arith.constant 0 : index
    %8 = vector.load %arg7[%c0_7, %c0_8] : memref<1x128xf32, #tpu.memory_space<vmem>>, vector<1x128xf32>
    %9 = vector.shape_cast %8 : vector<1x128xf32> to vector<1x128xf32>
    %10 = vector.broadcast %9 : vector<1x128xf32> to vector<2x128xf32>
    %c0_9 = arith.constant 0 : index
    %c0_10 = arith.constant 0 : index
    %11 = vector.load %arg9[%c0_9, %c0_10] : memref<1x16xf32, #tpu.memory_space<vmem>>, vector<1x16xf32>
    %12 = tpu.iota {dimensions = array<i32: 1>} : vector<2x128xi32>
    %c96_i32 = arith.constant 96 : i32
    %13 = vector.broadcast %c96_i32 : i32 to vector<2x128xi32>
    %14 = arith.cmpi slt, %12, %13 : vector<2x128xi32>
    %c0_11 = arith.constant 0 : index
    %c0_12 = arith.constant 0 : index
    %c0_13 = arith.constant 0 : index
    %15 = vector.load %arg1[%c0_11, %c0_12, %c0_13] : memref<2x8x16xf32, #tpu.memory_space<vmem>>, vector<2x8x16xf32>
    %16 = vector.shape_cast %15 : vector<2x8x16xf32> to vector<16x16xf32>
    %17 = arith.truncf %16 : vector<16x16xf32> to vector<16x16xbf16>
    %c0_14 = arith.constant 0 : index
    %c0_15 = arith.constant 0 : index
    %18 = vector.load %arg2[%c0_14, %c0_15] : memref<16x128xf32, #tpu.memory_space<vmem>>, vector<16x128xf32>
    %19 = arith.truncf %18 : vector<16x128xf32> to vector<16x128xbf16>
    %cst = arith.constant dense<0.000000e+00> : vector<16x128xf32>
    %20 = tpu.matmul %17, %19, %cst {dimension_numbers = #tpu.dot_dimension_numbers<[1], [0], [0], [1], [0, 0, 1, 1], [], []>} : vector<16x16xbf16>, vector<16x128xbf16>, vector<16x128xf32> -> vector<16x128xf32>
    %c0_16 = arith.constant 0 : index
    %c0_17 = arith.constant 0 : index
    %21 = vector.load %arg4[%c0_16, %c0_17] : memref<1x128xf32, #tpu.memory_space<vmem>>, vector<1x128xf32>
    %22 = vector.broadcast %21 : vector<1x128xf32> to vector<16x128xf32>
    %23 = arith.addf %20, %22 : vector<16x128xf32>
    %cst_18 = arith.constant 0.000000e+00 : f32
    %24 = vector.broadcast %cst_18 : f32 to vector<2x32xf32>
    %cst_19 = arith.constant 0.000000e+00 : f32
    %25 = vector.broadcast %cst_19 : f32 to vector<2x32xf32>
    %26 = vector.extract_strided_slice %23 {offsets = [0, 0], sizes = [1, 128], strides = [1, 1]} : vector<16x128xf32> to vector<1x128xf32>
    %27 = vector.extract_strided_slice %23 {offsets = [8, 0], sizes = [1, 128], strides = [1, 1]} : vector<16x128xf32> to vector<1x128xf32>
    %28 = tpu.concatenate %26, %27 in 0 : vector<1x128xf32>, vector<1x128xf32> -> vector<2x128xf32>
    %29 = arith.negf %28 : vector<2x128xf32>
    %30 = math.exp %29 : vector<2x128xf32>
    %cst_20 = arith.constant 1.000000e+00 : f32
    %31 = vector.broadcast %cst_20 : f32 to vector<2x128xf32>
    %32 = arith.addf %31, %30 : vector<2x128xf32>
    %33 = arith.divf %31, %32 : vector<2x128xf32>
    %34 = math.tanh %28 : vector<2x128xf32>
    %35 = arith.select %14, %33, %34 : vector<2x128xi1>, vector<2x128xf32>
    %36 = vector.extract_strided_slice %35 {offsets = [0, 0], sizes = [2, 32], strides = [1, 1]} : vector<2x128xf32> to vector<2x32xf32>
    %37 = vector.extract_strided_slice %35 {offsets = [0, 32], sizes = [2, 32], strides = [1, 1]} : vector<2x128xf32> to vector<2x32xf32>
    %38 = vector.extract_strided_slice %35 {offsets = [0, 64], sizes = [2, 32], strides = [1, 1]} : vector<2x128xf32> to vector<2x32xf32>
    %39 = vector.extract_strided_slice %35 {offsets = [0, 96], sizes = [2, 32], strides = [1, 1]} : vector<2x128xf32> to vector<2x32xf32>
    %40 = arith.mulf %36, %24 : vector<2x32xf32>
    %41 = arith.mulf %37, %25 : vector<2x32xf32>
    %42 = arith.addf %40, %41 : vector<2x32xf32>
    %43 = math.tanh %42 : vector<2x32xf32>
    %44 = arith.mulf %38, %43 : vector<2x32xf32>
    %45 = vector.extract_strided_slice %23 {offsets = [1, 0], sizes = [1, 128], strides = [1, 1]} : vector<16x128xf32> to vector<1x128xf32>
    %46 = vector.extract_strided_slice %23 {offsets = [9, 0], sizes = [1, 128], strides = [1, 1]} : vector<16x128xf32> to vector<1x128xf32>
    %47 = tpu.concatenate %45, %46 in 0 : vector<1x128xf32>, vector<1x128xf32> -> vector<2x128xf32>
    %48 = arith.truncf %44 : vector<2x32xf32> to vector<2x32xbf16>
    %cst_21 = arith.constant dense<0.000000e+00> : vector<2x128xf32>
    %49 = tpu.matmul %48, %1, %cst_21 {dimension_numbers = #tpu.dot_dimension_numbers<[1], [0], [0], [1], [0, 0, 1, 1], [], []>} : vector<2x32xbf16>, vector<32x128xbf16>, vector<2x128xf32> -> vector<2x128xf32>
    %50 = arith.addf %47, %49 : vector<2x128xf32>
    %51 = arith.negf %50 : vector<2x128xf32>
    %52 = math.exp %51 : vector<2x128xf32>
    %cst_22 = arith.constant 1.000000e+00 : f32
    %53 = vector.broadcast %cst_22 : f32 to vector<2x128xf32>
    %54 = arith.addf %53, %52 : vector<2x128xf32>
    %55 = arith.divf %53, %54 : vector<2x128xf32>
    %56 = math.tanh %50 : vector<2x128xf32>
    %57 = arith.select %14, %55, %56 : vector<2x128xi1>, vector<2x128xf32>
    %58 = vector.extract_strided_slice %57 {offsets = [0, 0], sizes = [2, 32], strides = [1, 1]} : vector<2x128xf32> to vector<2x32xf32>
    %59 = vector.extract_strided_slice %57 {offsets = [0, 32], sizes = [2, 32], strides = [1, 1]} : vector<2x128xf32> to vector<2x32xf32>
    %60 = vector.extract_strided_slice %57 {offsets = [0, 64], sizes = [2, 32], strides = [1, 1]} : vector<2x128xf32> to vector<2x32xf32>
    %61 = vector.extract_strided_slice %57 {offsets = [0, 96], sizes = [2, 32], strides = [1, 1]} : vector<2x128xf32> to vector<2x32xf32>
    %62 = arith.mulf %58, %42 : vector<2x32xf32>
    %63 = arith.mulf %59, %39 : vector<2x32xf32>
    %64 = arith.addf %62, %63 : vector<2x32xf32>
    %65 = math.tanh %64 : vector<2x32xf32>
    %66 = arith.mulf %60, %65 : vector<2x32xf32>
    %67 = vector.extract_strided_slice %23 {offsets = [2, 0], sizes = [1, 128], strides = [1, 1]} : vector<16x128xf32> to vector<1x128xf32>
    %68 = vector.extract_strided_slice %23 {offsets = [10, 0], sizes = [1, 128], strides = [1, 1]} : vector<16x128xf32> to vector<1x128xf32>
    %69 = tpu.concatenate %67, %68 in 0 : vector<1x128xf32>, vector<1x128xf32> -> vector<2x128xf32>
    %70 = arith.truncf %66 : vector<2x32xf32> to vector<2x32xbf16>
    %cst_23 = arith.constant dense<0.000000e+00> : vector<2x128xf32>
    %71 = tpu.matmul %70, %1, %cst_23 {dimension_numbers = #tpu.dot_dimension_numbers<[1], [0], [0], [1], [0, 0, 1, 1], [], []>} : vector<2x32xbf16>, vector<32x128xbf16>, vector<2x128xf32> -> vector<2x128xf32>
    %72 = arith.addf %69, %71 : vector<2x128xf32>
    %73 = arith.negf %72 : vector<2x128xf32>
    %74 = math.exp %73 : vector<2x128xf32>
    %cst_24 = arith.constant 1.000000e+00 : f32
    %75 = vector.broadcast %cst_24 : f32 to vector<2x128xf32>
    %76 = arith.addf %75, %74 : vector<2x128xf32>
    %77 = arith.divf %75, %76 : vector<2x128xf32>
    %78 = math.tanh %72 : vector<2x128xf32>
    %79 = arith.select %14, %77, %78 : vector<2x128xi1>, vector<2x128xf32>
    %80 = vector.extract_strided_slice %79 {offsets = [0, 0], sizes = [2, 32], strides = [1, 1]} : vector<2x128xf32> to vector<2x32xf32>
    %81 = vector.extract_strided_slice %79 {offsets = [0, 32], sizes = [2, 32], strides = [1, 1]} : vector<2x128xf32> to vector<2x32xf32>
    %82 = vector.extract_strided_slice %79 {offsets = [0, 64], sizes = [2, 32], strides = [1, 1]} : vector<2x128xf32> to vector<2x32xf32>
    %83 = vector.extract_strided_slice %79 {offsets = [0, 96], sizes = [2, 32], strides = [1, 1]} : vector<2x128xf32> to vector<2x32xf32>
    %84 = arith.mulf %80, %64 : vector<2x32xf32>
    %85 = arith.mulf %81, %61 : vector<2x32xf32>
    %86 = arith.addf %84, %85 : vector<2x32xf32>
    %87 = math.tanh %86 : vector<2x32xf32>
    %88 = arith.mulf %82, %87 : vector<2x32xf32>
    %89 = vector.extract_strided_slice %23 {offsets = [3, 0], sizes = [1, 128], strides = [1, 1]} : vector<16x128xf32> to vector<1x128xf32>
    %90 = vector.extract_strided_slice %23 {offsets = [11, 0], sizes = [1, 128], strides = [1, 1]} : vector<16x128xf32> to vector<1x128xf32>
    %91 = tpu.concatenate %89, %90 in 0 : vector<1x128xf32>, vector<1x128xf32> -> vector<2x128xf32>
    %92 = arith.truncf %88 : vector<2x32xf32> to vector<2x32xbf16>
    %cst_25 = arith.constant dense<0.000000e+00> : vector<2x128xf32>
    %93 = tpu.matmul %92, %1, %cst_25 {dimension_numbers = #tpu.dot_dimension_numbers<[1], [0], [0], [1], [0, 0, 1, 1], [], []>} : vector<2x32xbf16>, vector<32x128xbf16>, vector<2x128xf32> -> vector<2x128xf32>
    %94 = arith.addf %91, %93 : vector<2x128xf32>
    %95 = arith.negf %94 : vector<2x128xf32>
    %96 = math.exp %95 : vector<2x128xf32>
    %cst_26 = arith.constant 1.000000e+00 : f32
    %97 = vector.broadcast %cst_26 : f32 to vector<2x128xf32>
    %98 = arith.addf %97, %96 : vector<2x128xf32>
    %99 = arith.divf %97, %98 : vector<2x128xf32>
    %100 = math.tanh %94 : vector<2x128xf32>
    %101 = arith.select %14, %99, %100 : vector<2x128xi1>, vector<2x128xf32>
    %102 = vector.extract_strided_slice %101 {offsets = [0, 0], sizes = [2, 32], strides = [1, 1]} : vector<2x128xf32> to vector<2x32xf32>
    %103 = vector.extract_strided_slice %101 {offsets = [0, 32], sizes = [2, 32], strides = [1, 1]} : vector<2x128xf32> to vector<2x32xf32>
    %104 = vector.extract_strided_slice %101 {offsets = [0, 64], sizes = [2, 32], strides = [1, 1]} : vector<2x128xf32> to vector<2x32xf32>
    %105 = vector.extract_strided_slice %101 {offsets = [0, 96], sizes = [2, 32], strides = [1, 1]} : vector<2x128xf32> to vector<2x32xf32>
    %106 = arith.mulf %102, %86 : vector<2x32xf32>
    %107 = arith.mulf %103, %83 : vector<2x32xf32>
    %108 = arith.addf %106, %107 : vector<2x32xf32>
    %109 = math.tanh %108 : vector<2x32xf32>
    %110 = arith.mulf %104, %109 : vector<2x32xf32>
    %111 = vector.extract_strided_slice %23 {offsets = [4, 0], sizes = [1, 128], strides = [1, 1]} : vector<16x128xf32> to vector<1x128xf32>
    %112 = vector.extract_strided_slice %23 {offsets = [12, 0], sizes = [1, 128], strides = [1, 1]} : vector<16x128xf32> to vector<1x128xf32>
    %113 = tpu.concatenate %111, %112 in 0 : vector<1x128xf32>, vector<1x128xf32> -> vector<2x128xf32>
    %114 = arith.truncf %110 : vector<2x32xf32> to vector<2x32xbf16>
    %cst_27 = arith.constant dense<0.000000e+00> : vector<2x128xf32>
    %115 = tpu.matmul %114, %1, %cst_27 {dimension_numbers = #tpu.dot_dimension_numbers<[1], [0], [0], [1], [0, 0, 1, 1], [], []>} : vector<2x32xbf16>, vector<32x128xbf16>, vector<2x128xf32> -> vector<2x128xf32>
    %116 = arith.addf %113, %115 : vector<2x128xf32>
    %117 = arith.negf %116 : vector<2x128xf32>
    %118 = math.exp %117 : vector<2x128xf32>
    %cst_28 = arith.constant 1.000000e+00 : f32
    %119 = vector.broadcast %cst_28 : f32 to vector<2x128xf32>
    %120 = arith.addf %119, %118 : vector<2x128xf32>
    %121 = arith.divf %119, %120 : vector<2x128xf32>
    %122 = math.tanh %116 : vector<2x128xf32>
    %123 = arith.select %14, %121, %122 : vector<2x128xi1>, vector<2x128xf32>
    %124 = vector.extract_strided_slice %123 {offsets = [0, 0], sizes = [2, 32], strides = [1, 1]} : vector<2x128xf32> to vector<2x32xf32>
    %125 = vector.extract_strided_slice %123 {offsets = [0, 32], sizes = [2, 32], strides = [1, 1]} : vector<2x128xf32> to vector<2x32xf32>
    %126 = vector.extract_strided_slice %123 {offsets = [0, 64], sizes = [2, 32], strides = [1, 1]} : vector<2x128xf32> to vector<2x32xf32>
    %127 = vector.extract_strided_slice %123 {offsets = [0, 96], sizes = [2, 32], strides = [1, 1]} : vector<2x128xf32> to vector<2x32xf32>
    %128 = arith.mulf %124, %108 : vector<2x32xf32>
    %129 = arith.mulf %125, %105 : vector<2x32xf32>
    %130 = arith.addf %128, %129 : vector<2x32xf32>
    %131 = math.tanh %130 : vector<2x32xf32>
    %132 = arith.mulf %126, %131 : vector<2x32xf32>
    %133 = vector.extract_strided_slice %23 {offsets = [5, 0], sizes = [1, 128], strides = [1, 1]} : vector<16x128xf32> to vector<1x128xf32>
    %134 = vector.extract_strided_slice %23 {offsets = [13, 0], sizes = [1, 128], strides = [1, 1]} : vector<16x128xf32> to vector<1x128xf32>
    %135 = tpu.concatenate %133, %134 in 0 : vector<1x128xf32>, vector<1x128xf32> -> vector<2x128xf32>
    %136 = arith.truncf %132 : vector<2x32xf32> to vector<2x32xbf16>
    %cst_29 = arith.constant dense<0.000000e+00> : vector<2x128xf32>
    %137 = tpu.matmul %136, %1, %cst_29 {dimension_numbers = #tpu.dot_dimension_numbers<[1], [0], [0], [1], [0, 0, 1, 1], [], []>} : vector<2x32xbf16>, vector<32x128xbf16>, vector<2x128xf32> -> vector<2x128xf32>
    %138 = arith.addf %135, %137 : vector<2x128xf32>
    %139 = arith.negf %138 : vector<2x128xf32>
    %140 = math.exp %139 : vector<2x128xf32>
    %cst_30 = arith.constant 1.000000e+00 : f32
    %141 = vector.broadcast %cst_30 : f32 to vector<2x128xf32>
    %142 = arith.addf %141, %140 : vector<2x128xf32>
    %143 = arith.divf %141, %142 : vector<2x128xf32>
    %144 = math.tanh %138 : vector<2x128xf32>
    %145 = arith.select %14, %143, %144 : vector<2x128xi1>, vector<2x128xf32>
    %146 = vector.extract_strided_slice %145 {offsets = [0, 0], sizes = [2, 32], strides = [1, 1]} : vector<2x128xf32> to vector<2x32xf32>
    %147 = vector.extract_strided_slice %145 {offsets = [0, 32], sizes = [2, 32], strides = [1, 1]} : vector<2x128xf32> to vector<2x32xf32>
    %148 = vector.extract_strided_slice %145 {offsets = [0, 64], sizes = [2, 32], strides = [1, 1]} : vector<2x128xf32> to vector<2x32xf32>
    %149 = vector.extract_strided_slice %145 {offsets = [0, 96], sizes = [2, 32], strides = [1, 1]} : vector<2x128xf32> to vector<2x32xf32>
    %150 = arith.mulf %146, %130 : vector<2x32xf32>
    %151 = arith.mulf %147, %127 : vector<2x32xf32>
    %152 = arith.addf %150, %151 : vector<2x32xf32>
    %153 = math.tanh %152 : vector<2x32xf32>
    %154 = arith.mulf %148, %153 : vector<2x32xf32>
    %155 = vector.extract_strided_slice %23 {offsets = [6, 0], sizes = [1, 128], strides = [1, 1]} : vector<16x128xf32> to vector<1x128xf32>
    %156 = vector.extract_strided_slice %23 {offsets = [14, 0], sizes = [1, 128], strides = [1, 1]} : vector<16x128xf32> to vector<1x128xf32>
    %157 = tpu.concatenate %155, %156 in 0 : vector<1x128xf32>, vector<1x128xf32> -> vector<2x128xf32>
    %158 = arith.truncf %154 : vector<2x32xf32> to vector<2x32xbf16>
    %cst_31 = arith.constant dense<0.000000e+00> : vector<2x128xf32>
    %159 = tpu.matmul %158, %1, %cst_31 {dimension_numbers = #tpu.dot_dimension_numbers<[1], [0], [0], [1], [0, 0, 1, 1], [], []>} : vector<2x32xbf16>, vector<32x128xbf16>, vector<2x128xf32> -> vector<2x128xf32>
    %160 = arith.addf %157, %159 : vector<2x128xf32>
    %161 = arith.negf %160 : vector<2x128xf32>
    %162 = math.exp %161 : vector<2x128xf32>
    %cst_32 = arith.constant 1.000000e+00 : f32
    %163 = vector.broadcast %cst_32 : f32 to vector<2x128xf32>
    %164 = arith.addf %163, %162 : vector<2x128xf32>
    %165 = arith.divf %163, %164 : vector<2x128xf32>
    %166 = math.tanh %160 : vector<2x128xf32>
    %167 = arith.select %14, %165, %166 : vector<2x128xi1>, vector<2x128xf32>
    %168 = vector.extract_strided_slice %167 {offsets = [0, 0], sizes = [2, 32], strides = [1, 1]} : vector<2x128xf32> to vector<2x32xf32>
    %169 = vector.extract_strided_slice %167 {offsets = [0, 32], sizes = [2, 32], strides = [1, 1]} : vector<2x128xf32> to vector<2x32xf32>
    %170 = vector.extract_strided_slice %167 {offsets = [0, 64], sizes = [2, 32], strides = [1, 1]} : vector<2x128xf32> to vector<2x32xf32>
    %171 = vector.extract_strided_slice %167 {offsets = [0, 96], sizes = [2, 32], strides = [1, 1]} : vector<2x128xf32> to vector<2x32xf32>
    %172 = arith.mulf %168, %152 : vector<2x32xf32>
    %173 = arith.mulf %169, %149 : vector<2x32xf32>
    %174 = arith.addf %172, %173 : vector<2x32xf32>
    %175 = math.tanh %174 : vector<2x32xf32>
    %176 = arith.mulf %170, %175 : vector<2x32xf32>
    %177 = vector.extract_strided_slice %23 {offsets = [7, 0], sizes = [1, 128], strides = [1, 1]} : vector<16x128xf32> to vector<1x128xf32>
    %178 = vector.extract_strided_slice %23 {offsets = [15, 0], sizes = [1, 128], strides = [1, 1]} : vector<16x128xf32> to vector<1x128xf32>
    %179 = tpu.concatenate %177, %178 in 0 : vector<1x128xf32>, vector<1x128xf32> -> vector<2x128xf32>
    %180 = arith.truncf %176 : vector<2x32xf32> to vector<2x32xbf16>
    %cst_33 = arith.constant dense<0.000000e+00> : vector<2x128xf32>
    %181 = tpu.matmul %180, %1, %cst_33 {dimension_numbers = #tpu.dot_dimension_numbers<[1], [0], [0], [1], [0, 0, 1, 1], [], []>} : vector<2x32xbf16>, vector<32x128xbf16>, vector<2x128xf32> -> vector<2x128xf32>
    %182 = arith.addf %179, %181 : vector<2x128xf32>
    %183 = arith.negf %182 : vector<2x128xf32>
    %184 = math.exp %183 : vector<2x128xf32>
    %cst_34 = arith.constant 1.000000e+00 : f32
    %185 = vector.broadcast %cst_34 : f32 to vector<2x128xf32>
    %186 = arith.addf %185, %184 : vector<2x128xf32>
    %187 = arith.divf %185, %186 : vector<2x128xf32>
    %188 = math.tanh %182 : vector<2x128xf32>
    %189 = arith.select %14, %187, %188 : vector<2x128xi1>, vector<2x128xf32>
    %190 = vector.extract_strided_slice %189 {offsets = [0, 0], sizes = [2, 32], strides = [1, 1]} : vector<2x128xf32> to vector<2x32xf32>
    %191 = vector.extract_strided_slice %189 {offsets = [0, 32], sizes = [2, 32], strides = [1, 1]} : vector<2x128xf32> to vector<2x32xf32>
    %192 = vector.extract_strided_slice %189 {offsets = [0, 64], sizes = [2, 32], strides = [1, 1]} : vector<2x128xf32> to vector<2x32xf32>
    %193 = vector.extract_strided_slice %189 {offsets = [0, 96], sizes = [2, 32], strides = [1, 1]} : vector<2x128xf32> to vector<2x32xf32>
    %194 = arith.mulf %190, %174 : vector<2x32xf32>
    %195 = arith.mulf %191, %171 : vector<2x32xf32>
    %196 = arith.addf %194, %195 : vector<2x32xf32>
    %197 = math.tanh %196 : vector<2x32xf32>
    %198 = arith.mulf %192, %197 : vector<2x32xf32>
    %199 = arith.truncf %198 : vector<2x32xf32> to vector<2x32xbf16>
    %cst_35 = arith.constant dense<0.000000e+00> : vector<2x128xf32>
    %200 = tpu.matmul %199, %5, %cst_35 {dimension_numbers = #tpu.dot_dimension_numbers<[1], [0], [0], [1], [0, 0, 1, 1], [], []>} : vector<2x32xbf16>, vector<32x128xbf16>, vector<2x128xf32> -> vector<2x128xf32>
    %201 = arith.addf %200, %10 : vector<2x128xf32>
    %202 = arith.negf %201 : vector<2x128xf32>
    %203 = math.exp %202 : vector<2x128xf32>
    %cst_36 = arith.constant 1.000000e+00 : f32
    %204 = vector.broadcast %cst_36 : f32 to vector<2x128xf32>
    %205 = arith.addf %204, %203 : vector<2x128xf32>
    %206 = arith.divf %204, %205 : vector<2x128xf32>
    %207 = math.tanh %201 : vector<2x128xf32>
    %208 = arith.select %14, %206, %207 : vector<2x128xi1>, vector<2x128xf32>
    %209 = vector.extract_strided_slice %208 {offsets = [0, 0], sizes = [2, 32], strides = [1, 1]} : vector<2x128xf32> to vector<2x32xf32>
    %210 = vector.extract_strided_slice %208 {offsets = [0, 32], sizes = [2, 32], strides = [1, 1]} : vector<2x128xf32> to vector<2x32xf32>
    %211 = vector.extract_strided_slice %208 {offsets = [0, 64], sizes = [2, 32], strides = [1, 1]} : vector<2x128xf32> to vector<2x32xf32>
    %212 = vector.extract_strided_slice %208 {offsets = [0, 96], sizes = [2, 32], strides = [1, 1]} : vector<2x128xf32> to vector<2x32xf32>
    %213 = arith.mulf %209, %196 : vector<2x32xf32>
    %214 = arith.mulf %210, %193 : vector<2x32xf32>
    %215 = arith.addf %213, %214 : vector<2x32xf32>
    %216 = math.tanh %215 : vector<2x32xf32>
    %217 = arith.mulf %211, %216 : vector<2x32xf32>
    %218 = vector.extract_strided_slice %217 {offsets = [0, 0], sizes = [1, 32], strides = [1, 1]} : vector<2x32xf32> to vector<1x32xf32>
    %c0_37 = arith.constant 0 : index
    %c0_38 = arith.constant 0 : index
    %219 = vector.load %arg11[%c0_37, %c0_38] : memref<16x32xf32, #tpu.memory_space<vmem>>, vector<1x32xf32>
    tpu.vector_store %arg11[%c0_37, %c0_38], %218 {strides = array<i32>} : memref<16x32xf32, #tpu.memory_space<vmem>>, vector<1x32xf32>,
    %220 = vector.extract_strided_slice %217 {offsets = [1, 0], sizes = [1, 32], strides = [1, 1]} : vector<2x32xf32> to vector<1x32xf32>
    %c8 = arith.constant 8 : index
    %c0_39 = arith.constant 0 : index
    %221 = vector.load %arg11[%c8, %c0_39] : memref<16x32xf32, #tpu.memory_space<vmem>>, vector<1x32xf32>
    tpu.vector_store %arg11[%c8, %c0_39], %220 {strides = array<i32>} : memref<16x32xf32, #tpu.memory_space<vmem>>, vector<1x32xf32>,
    %222 = arith.truncf %217 : vector<2x32xf32> to vector<2x32xbf16>
    %cst_40 = arith.constant dense<0.000000e+00> : vector<2x128xf32>
    %223 = tpu.matmul %222, %5, %cst_40 {dimension_numbers = #tpu.dot_dimension_numbers<[1], [0], [0], [1], [0, 0, 1, 1], [], []>} : vector<2x32xbf16>, vector<32x128xbf16>, vector<2x128xf32> -> vector<2x128xf32>
    %224 = arith.addf %223, %10 : vector<2x128xf32>
    %225 = arith.negf %224 : vector<2x128xf32>
    %226 = math.exp %225 : vector<2x128xf32>
    %cst_41 = arith.constant 1.000000e+00 : f32
    %227 = vector.broadcast %cst_41 : f32 to vector<2x128xf32>
    %228 = arith.addf %227, %226 : vector<2x128xf32>
    %229 = arith.divf %227, %228 : vector<2x128xf32>
    %230 = math.tanh %224 : vector<2x128xf32>
    %231 = arith.select %14, %229, %230 : vector<2x128xi1>, vector<2x128xf32>
    %232 = vector.extract_strided_slice %231 {offsets = [0, 0], sizes = [2, 32], strides = [1, 1]} : vector<2x128xf32> to vector<2x32xf32>
    %233 = vector.extract_strided_slice %231 {offsets = [0, 32], sizes = [2, 32], strides = [1, 1]} : vector<2x128xf32> to vector<2x32xf32>
    %234 = vector.extract_strided_slice %231 {offsets = [0, 64], sizes = [2, 32], strides = [1, 1]} : vector<2x128xf32> to vector<2x32xf32>
    %235 = vector.extract_strided_slice %231 {offsets = [0, 96], sizes = [2, 32], strides = [1, 1]} : vector<2x128xf32> to vector<2x32xf32>
    %236 = arith.mulf %232, %215 : vector<2x32xf32>
    %237 = arith.mulf %233, %212 : vector<2x32xf32>
    %238 = arith.addf %236, %237 : vector<2x32xf32>
    %239 = math.tanh %238 : vector<2x32xf32>
    %240 = arith.mulf %234, %239 : vector<2x32xf32>
    %241 = vector.extract_strided_slice %240 {offsets = [0, 0], sizes = [1, 32], strides = [1, 1]} : vector<2x32xf32> to vector<1x32xf32>
    %c1 = arith.constant 1 : index
    %c0_42 = arith.constant 0 : index
    %242 = vector.load %arg11[%c1, %c0_42] : memref<16x32xf32, #tpu.memory_space<vmem>>, vector<1x32xf32>
    tpu.vector_store %arg11[%c1, %c0_42], %241 {strides = array<i32>} : memref<16x32xf32, #tpu.memory_space<vmem>>, vector<1x32xf32>,
    %243 = vector.extract_strided_slice %240 {offsets = [1, 0], sizes = [1, 32], strides = [1, 1]} : vector<2x32xf32> to vector<1x32xf32>
    %c9 = arith.constant 9 : index
    %c0_43 = arith.constant 0 : index
    %244 = vector.load %arg11[%c9, %c0_43] : memref<16x32xf32, #tpu.memory_space<vmem>>, vector<1x32xf32>
    tpu.vector_store %arg11[%c9, %c0_43], %243 {strides = array<i32>} : memref<16x32xf32, #tpu.memory_space<vmem>>, vector<1x32xf32>,
    %245 = arith.truncf %240 : vector<2x32xf32> to vector<2x32xbf16>
    %cst_44 = arith.constant dense<0.000000e+00> : vector<2x128xf32>
    %246 = tpu.matmul %245, %5, %cst_44 {dimension_numbers = #tpu.dot_dimension_numbers<[1], [0], [0], [1], [0, 0, 1, 1], [], []>} : vector<2x32xbf16>, vector<32x128xbf16>, vector<2x128xf32> -> vector<2x128xf32>
    %247 = arith.addf %246, %10 : vector<2x128xf32>
    %248 = arith.negf %247 : vector<2x128xf32>
    %249 = math.exp %248 : vector<2x128xf32>
    %cst_45 = arith.constant 1.000000e+00 : f32
    %250 = vector.broadcast %cst_45 : f32 to vector<2x128xf32>
    %251 = arith.addf %250, %249 : vector<2x128xf32>
    %252 = arith.divf %250, %251 : vector<2x128xf32>
    %253 = math.tanh %247 : vector<2x128xf32>
    %254 = arith.select %14, %252, %253 : vector<2x128xi1>, vector<2x128xf32>
    %255 = vector.extract_strided_slice %254 {offsets = [0, 0], sizes = [2, 32], strides = [1, 1]} : vector<2x128xf32> to vector<2x32xf32>
    %256 = vector.extract_strided_slice %254 {offsets = [0, 32], sizes = [2, 32], strides = [1, 1]} : vector<2x128xf32> to vector<2x32xf32>
    %257 = vector.extract_strided_slice %254 {offsets = [0, 64], sizes = [2, 32], strides = [1, 1]} : vector<2x128xf32> to vector<2x32xf32>
    %258 = vector.extract_strided_slice %254 {offsets = [0, 96], sizes = [2, 32], strides = [1, 1]} : vector<2x128xf32> to vector<2x32xf32>
    %259 = arith.mulf %255, %238 : vector<2x32xf32>
    %260 = arith.mulf %256, %235 : vector<2x32xf32>
    %261 = arith.addf %259, %260 : vector<2x32xf32>
    %262 = math.tanh %261 : vector<2x32xf32>
    %263 = arith.mulf %257, %262 : vector<2x32xf32>
    %264 = vector.extract_strided_slice %263 {offsets = [0, 0], sizes = [1, 32], strides = [1, 1]} : vector<2x32xf32> to vector<1x32xf32>
    %c2 = arith.constant 2 : index
    %c0_46 = arith.constant 0 : index
    %265 = vector.load %arg11[%c2, %c0_46] : memref<16x32xf32, #tpu.memory_space<vmem>>, vector<1x32xf32>
    tpu.vector_store %arg11[%c2, %c0_46], %264 {strides = array<i32>} : memref<16x32xf32, #tpu.memory_space<vmem>>, vector<1x32xf32>,
    %266 = vector.extract_strided_slice %263 {offsets = [1, 0], sizes = [1, 32], strides = [1, 1]} : vector<2x32xf32> to vector<1x32xf32>
    %c10 = arith.constant 10 : index
    %c0_47 = arith.constant 0 : index
    %267 = vector.load %arg11[%c10, %c0_47] : memref<16x32xf32, #tpu.memory_space<vmem>>, vector<1x32xf32>
    tpu.vector_store %arg11[%c10, %c0_47], %266 {strides = array<i32>} : memref<16x32xf32, #tpu.memory_space<vmem>>, vector<1x32xf32>,
    %268 = arith.truncf %263 : vector<2x32xf32> to vector<2x32xbf16>
    %cst_48 = arith.constant dense<0.000000e+00> : vector<2x128xf32>
    %269 = tpu.matmul %268, %5, %cst_48 {dimension_numbers = #tpu.dot_dimension_numbers<[1], [0], [0], [1], [0, 0, 1, 1], [], []>} : vector<2x32xbf16>, vector<32x128xbf16>, vector<2x128xf32> -> vector<2x128xf32>
    %270 = arith.addf %269, %10 : vector<2x128xf32>
    %271 = arith.negf %270 : vector<2x128xf32>
    %272 = math.exp %271 : vector<2x128xf32>
    %cst_49 = arith.constant 1.000000e+00 : f32
    %273 = vector.broadcast %cst_49 : f32 to vector<2x128xf32>
    %274 = arith.addf %273, %272 : vector<2x128xf32>
    %275 = arith.divf %273, %274 : vector<2x128xf32>
    %276 = math.tanh %270 : vector<2x128xf32>
    %277 = arith.select %14, %275, %276 : vector<2x128xi1>, vector<2x128xf32>
    %278 = vector.extract_strided_slice %277 {offsets = [0, 0], sizes = [2, 32], strides = [1, 1]} : vector<2x128xf32> to vector<2x32xf32>
    %279 = vector.extract_strided_slice %277 {offsets = [0, 32], sizes = [2, 32], strides = [1, 1]} : vector<2x128xf32> to vector<2x32xf32>
    %280 = vector.extract_strided_slice %277 {offsets = [0, 64], sizes = [2, 32], strides = [1, 1]} : vector<2x128xf32> to vector<2x32xf32>
    %281 = vector.extract_strided_slice %277 {offsets = [0, 96], sizes = [2, 32], strides = [1, 1]} : vector<2x128xf32> to vector<2x32xf32>
    %282 = arith.mulf %278, %261 : vector<2x32xf32>
    %283 = arith.mulf %279, %258 : vector<2x32xf32>
    %284 = arith.addf %282, %283 : vector<2x32xf32>
    %285 = math.tanh %284 : vector<2x32xf32>
    %286 = arith.mulf %280, %285 : vector<2x32xf32>
    %287 = vector.extract_strided_slice %286 {offsets = [0, 0], sizes = [1, 32], strides = [1, 1]} : vector<2x32xf32> to vector<1x32xf32>
    %c3 = arith.constant 3 : index
    %c0_50 = arith.constant 0 : index
    %288 = vector.load %arg11[%c3, %c0_50] : memref<16x32xf32, #tpu.memory_space<vmem>>, vector<1x32xf32>
    tpu.vector_store %arg11[%c3, %c0_50], %287 {strides = array<i32>} : memref<16x32xf32, #tpu.memory_space<vmem>>, vector<1x32xf32>,
    %289 = vector.extract_strided_slice %286 {offsets = [1, 0], sizes = [1, 32], strides = [1, 1]} : vector<2x32xf32> to vector<1x32xf32>
    %c11 = arith.constant 11 : index
    %c0_51 = arith.constant 0 : index
    %290 = vector.load %arg11[%c11, %c0_51] : memref<16x32xf32, #tpu.memory_space<vmem>>, vector<1x32xf32>
    tpu.vector_store %arg11[%c11, %c0_51], %289 {strides = array<i32>} : memref<16x32xf32, #tpu.memory_space<vmem>>, vector<1x32xf32>,
    %291 = arith.truncf %286 : vector<2x32xf32> to vector<2x32xbf16>
    %cst_52 = arith.constant dense<0.000000e+00> : vector<2x128xf32>
    %292 = tpu.matmul %291, %5, %cst_52 {dimension_numbers = #tpu.dot_dimension_numbers<[1], [0], [0], [1], [0, 0, 1, 1], [], []>} : vector<2x32xbf16>, vector<32x128xbf16>, vector<2x128xf32> -> vector<2x128xf32>
    %293 = arith.addf %292, %10 : vector<2x128xf32>
    %294 = arith.negf %293 : vector<2x128xf32>
    %295 = math.exp %294 : vector<2x128xf32>
    %cst_53 = arith.constant 1.000000e+00 : f32
    %296 = vector.broadcast %cst_53 : f32 to vector<2x128xf32>
    %297 = arith.addf %296, %295 : vector<2x128xf32>
    %298 = arith.divf %296, %297 : vector<2x128xf32>
    %299 = math.tanh %293 : vector<2x128xf32>
    %300 = arith.select %14, %298, %299 : vector<2x128xi1>, vector<2x128xf32>
    %301 = vector.extract_strided_slice %300 {offsets = [0, 0], sizes = [2, 32], strides = [1, 1]} : vector<2x128xf32> to vector<2x32xf32>
    %302 = vector.extract_strided_slice %300 {offsets = [0, 32], sizes = [2, 32], strides = [1, 1]} : vector<2x128xf32> to vector<2x32xf32>
    %303 = vector.extract_strided_slice %300 {offsets = [0, 64], sizes = [2, 32], strides = [1, 1]} : vector<2x128xf32> to vector<2x32xf32>
    %304 = vector.extract_strided_slice %300 {offsets = [0, 96], sizes = [2, 32], strides = [1, 1]} : vector<2x128xf32> to vector<2x32xf32>
    %305 = arith.mulf %301, %284 : vector<2x32xf32>
    %306 = arith.mulf %302, %281 : vector<2x32xf32>
    %307 = arith.addf %305, %306 : vector<2x32xf32>
    %308 = math.tanh %307 : vector<2x32xf32>
    %309 = arith.mulf %303, %308 : vector<2x32xf32>
    %310 = vector.extract_strided_slice %309 {offsets = [0, 0], sizes = [1, 32], strides = [1, 1]} : vector<2x32xf32> to vector<1x32xf32>
    %c4 = arith.constant 4 : index
    %c0_54 = arith.constant 0 : index
    %311 = vector.load %arg11[%c4, %c0_54] : memref<16x32xf32, #tpu.memory_space<vmem>>, vector<1x32xf32>
    tpu.vector_store %arg11[%c4, %c0_54], %310 {strides = array<i32>} : memref<16x32xf32, #tpu.memory_space<vmem>>, vector<1x32xf32>,
    %312 = vector.extract_strided_slice %309 {offsets = [1, 0], sizes = [1, 32], strides = [1, 1]} : vector<2x32xf32> to vector<1x32xf32>
    %c12 = arith.constant 12 : index
    %c0_55 = arith.constant 0 : index
    %313 = vector.load %arg11[%c12, %c0_55] : memref<16x32xf32, #tpu.memory_space<vmem>>, vector<1x32xf32>
    tpu.vector_store %arg11[%c12, %c0_55], %312 {strides = array<i32>} : memref<16x32xf32, #tpu.memory_space<vmem>>, vector<1x32xf32>,
    %314 = arith.truncf %309 : vector<2x32xf32> to vector<2x32xbf16>
    %cst_56 = arith.constant dense<0.000000e+00> : vector<2x128xf32>
    %315 = tpu.matmul %314, %5, %cst_56 {dimension_numbers = #tpu.dot_dimension_numbers<[1], [0], [0], [1], [0, 0, 1, 1], [], []>} : vector<2x32xbf16>, vector<32x128xbf16>, vector<2x128xf32> -> vector<2x128xf32>
    %316 = arith.addf %315, %10 : vector<2x128xf32>
    %317 = arith.negf %316 : vector<2x128xf32>
    %318 = math.exp %317 : vector<2x128xf32>
    %cst_57 = arith.constant 1.000000e+00 : f32
    %319 = vector.broadcast %cst_57 : f32 to vector<2x128xf32>
    %320 = arith.addf %319, %318 : vector<2x128xf32>
    %321 = arith.divf %319, %320 : vector<2x128xf32>
    %322 = math.tanh %316 : vector<2x128xf32>
    %323 = arith.select %14, %321, %322 : vector<2x128xi1>, vector<2x128xf32>
    %324 = vector.extract_strided_slice %323 {offsets = [0, 0], sizes = [2, 32], strides = [1, 1]} : vector<2x128xf32> to vector<2x32xf32>
    %325 = vector.extract_strided_slice %323 {offsets = [0, 32], sizes = [2, 32], strides = [1, 1]} : vector<2x128xf32> to vector<2x32xf32>
    %326 = vector.extract_strided_slice %323 {offsets = [0, 64], sizes = [2, 32], strides = [1, 1]} : vector<2x128xf32> to vector<2x32xf32>
    %327 = vector.extract_strided_slice %323 {offsets = [0, 96], sizes = [2, 32], strides = [1, 1]} : vector<2x128xf32> to vector<2x32xf32>
    %328 = arith.mulf %324, %307 : vector<2x32xf32>
    %329 = arith.mulf %325, %304 : vector<2x32xf32>
    %330 = arith.addf %328, %329 : vector<2x32xf32>
    %331 = math.tanh %330 : vector<2x32xf32>
    %332 = arith.mulf %326, %331 : vector<2x32xf32>
    %333 = vector.extract_strided_slice %332 {offsets = [0, 0], sizes = [1, 32], strides = [1, 1]} : vector<2x32xf32> to vector<1x32xf32>
    %c5 = arith.constant 5 : index
    %c0_58 = arith.constant 0 : index
    %334 = vector.load %arg11[%c5, %c0_58] : memref<16x32xf32, #tpu.memory_space<vmem>>, vector<1x32xf32>
    tpu.vector_store %arg11[%c5, %c0_58], %333 {strides = array<i32>} : memref<16x32xf32, #tpu.memory_space<vmem>>, vector<1x32xf32>,
    %335 = vector.extract_strided_slice %332 {offsets = [1, 0], sizes = [1, 32], strides = [1, 1]} : vector<2x32xf32> to vector<1x32xf32>
    %c13 = arith.constant 13 : index
    %c0_59 = arith.constant 0 : index
    %336 = vector.load %arg11[%c13, %c0_59] : memref<16x32xf32, #tpu.memory_space<vmem>>, vector<1x32xf32>
    tpu.vector_store %arg11[%c13, %c0_59], %335 {strides = array<i32>} : memref<16x32xf32, #tpu.memory_space<vmem>>, vector<1x32xf32>,
    %337 = arith.truncf %332 : vector<2x32xf32> to vector<2x32xbf16>
    %cst_60 = arith.constant dense<0.000000e+00> : vector<2x128xf32>
    %338 = tpu.matmul %337, %5, %cst_60 {dimension_numbers = #tpu.dot_dimension_numbers<[1], [0], [0], [1], [0, 0, 1, 1], [], []>} : vector<2x32xbf16>, vector<32x128xbf16>, vector<2x128xf32> -> vector<2x128xf32>
    %339 = arith.addf %338, %10 : vector<2x128xf32>
    %340 = arith.negf %339 : vector<2x128xf32>
    %341 = math.exp %340 : vector<2x128xf32>
    %cst_61 = arith.constant 1.000000e+00 : f32
    %342 = vector.broadcast %cst_61 : f32 to vector<2x128xf32>
    %343 = arith.addf %342, %341 : vector<2x128xf32>
    %344 = arith.divf %342, %343 : vector<2x128xf32>
    %345 = math.tanh %339 : vector<2x128xf32>
    %346 = arith.select %14, %344, %345 : vector<2x128xi1>, vector<2x128xf32>
    %347 = vector.extract_strided_slice %346 {offsets = [0, 0], sizes = [2, 32], strides = [1, 1]} : vector<2x128xf32> to vector<2x32xf32>
    %348 = vector.extract_strided_slice %346 {offsets = [0, 32], sizes = [2, 32], strides = [1, 1]} : vector<2x128xf32> to vector<2x32xf32>
    %349 = vector.extract_strided_slice %346 {offsets = [0, 64], sizes = [2, 32], strides = [1, 1]} : vector<2x128xf32> to vector<2x32xf32>
    %350 = vector.extract_strided_slice %346 {offsets = [0, 96], sizes = [2, 32], strides = [1, 1]} : vector<2x128xf32> to vector<2x32xf32>
    %351 = arith.mulf %347, %330 : vector<2x32xf32>
    %352 = arith.mulf %348, %327 : vector<2x32xf32>
    %353 = arith.addf %351, %352 : vector<2x32xf32>
    %354 = math.tanh %353 : vector<2x32xf32>
    %355 = arith.mulf %349, %354 : vector<2x32xf32>
    %356 = vector.extract_strided_slice %355 {offsets = [0, 0], sizes = [1, 32], strides = [1, 1]} : vector<2x32xf32> to vector<1x32xf32>
    %c6 = arith.constant 6 : index
    %c0_62 = arith.constant 0 : index
    %357 = vector.load %arg11[%c6, %c0_62] : memref<16x32xf32, #tpu.memory_space<vmem>>, vector<1x32xf32>
    tpu.vector_store %arg11[%c6, %c0_62], %356 {strides = array<i32>} : memref<16x32xf32, #tpu.memory_space<vmem>>, vector<1x32xf32>,
    %358 = vector.extract_strided_slice %355 {offsets = [1, 0], sizes = [1, 32], strides = [1, 1]} : vector<2x32xf32> to vector<1x32xf32>
    %c14 = arith.constant 14 : index
    %c0_63 = arith.constant 0 : index
    %359 = vector.load %arg11[%c14, %c0_63] : memref<16x32xf32, #tpu.memory_space<vmem>>, vector<1x32xf32>
    tpu.vector_store %arg11[%c14, %c0_63], %358 {strides = array<i32>} : memref<16x32xf32, #tpu.memory_space<vmem>>, vector<1x32xf32>,
    %360 = arith.truncf %355 : vector<2x32xf32> to vector<2x32xbf16>
    %cst_64 = arith.constant dense<0.000000e+00> : vector<2x128xf32>
    %361 = tpu.matmul %360, %5, %cst_64 {dimension_numbers = #tpu.dot_dimension_numbers<[1], [0], [0], [1], [0, 0, 1, 1], [], []>} : vector<2x32xbf16>, vector<32x128xbf16>, vector<2x128xf32> -> vector<2x128xf32>
    %362 = arith.addf %361, %10 : vector<2x128xf32>
    %363 = arith.negf %362 : vector<2x128xf32>
    %364 = math.exp %363 : vector<2x128xf32>
    %cst_65 = arith.constant 1.000000e+00 : f32
    %365 = vector.broadcast %cst_65 : f32 to vector<2x128xf32>
    %366 = arith.addf %365, %364 : vector<2x128xf32>
    %367 = arith.divf %365, %366 : vector<2x128xf32>
    %368 = math.tanh %362 : vector<2x128xf32>
    %369 = arith.select %14, %367, %368 : vector<2x128xi1>, vector<2x128xf32>
    %370 = vector.extract_strided_slice %369 {offsets = [0, 0], sizes = [2, 32], strides = [1, 1]} : vector<2x128xf32> to vector<2x32xf32>
    %371 = vector.extract_strided_slice %369 {offsets = [0, 32], sizes = [2, 32], strides = [1, 1]} : vector<2x128xf32> to vector<2x32xf32>
    %372 = vector.extract_strided_slice %369 {offsets = [0, 64], sizes = [2, 32], strides = [1, 1]} : vector<2x128xf32> to vector<2x32xf32>
    %373 = arith.mulf %370, %353 : vector<2x32xf32>
    %374 = arith.mulf %371, %350 : vector<2x32xf32>
    %375 = arith.addf %373, %374 : vector<2x32xf32>
    %376 = math.tanh %375 : vector<2x32xf32>
    %377 = arith.mulf %372, %376 : vector<2x32xf32>
    %378 = vector.extract_strided_slice %377 {offsets = [0, 0], sizes = [1, 32], strides = [1, 1]} : vector<2x32xf32> to vector<1x32xf32>
    %c7 = arith.constant 7 : index
    %c0_66 = arith.constant 0 : index
    %379 = vector.load %arg11[%c7, %c0_66] : memref<16x32xf32, #tpu.memory_space<vmem>>, vector<1x32xf32>
    tpu.vector_store %arg11[%c7, %c0_66], %378 {strides = array<i32>} : memref<16x32xf32, #tpu.memory_space<vmem>>, vector<1x32xf32>,
    %380 = vector.extract_strided_slice %377 {offsets = [1, 0], sizes = [1, 32], strides = [1, 1]} : vector<2x32xf32> to vector<1x32xf32>
    %c15 = arith.constant 15 : index
    %c0_67 = arith.constant 0 : index
    %381 = vector.load %arg11[%c15, %c0_67] : memref<16x32xf32, #tpu.memory_space<vmem>>, vector<1x32xf32>
    tpu.vector_store %arg11[%c15, %c0_67], %380 {strides = array<i32>} : memref<16x32xf32, #tpu.memory_space<vmem>>, vector<1x32xf32>,
    %c0_68 = arith.constant 0 : index
    %c0_69 = arith.constant 0 : index
    %382 = vector.load %arg11[%c0_68, %c0_69] : memref<16x32xf32, #tpu.memory_space<vmem>>, vector<16x32xf32>
    %383 = arith.truncf %382 : vector<16x32xf32> to vector<16x32xbf16>
    %cst_70 = arith.constant dense<0.000000e+00> : vector<16x16xf32>
    %384 = tpu.matmul %383, %7, %cst_70 {dimension_numbers = #tpu.dot_dimension_numbers<[1], [0], [0], [1], [0, 0, 1, 1], [], []>} : vector<16x32xbf16>, vector<32x16xbf16>, vector<16x16xf32> -> vector<16x16xf32>
    %385 = vector.broadcast %11 : vector<1x16xf32> to vector<16x16xf32>
    %386 = arith.addf %384, %385 : vector<16x16xf32>
    %387 = vector.shape_cast %386 : vector<16x16xf32> to vector<2x8x16xf32>
    %c0_71 = arith.constant 0 : index
    %c0_72 = arith.constant 0 : index
    %c0_73 = arith.constant 0 : index
    %388 = vector.load %arg10[%c0_71, %c0_72, %c0_73] : memref<2x8x16xf32, #tpu.memory_space<vmem>>, vector<2x8x16xf32>
    tpu.vector_store %arg10[%c0_71, %c0_72, %c0_73], %387 {strides = array<i32>} : memref<2x8x16xf32, #tpu.memory_space<vmem>>, vector<2x8x16xf32>,
    return
  }
  func.func @transform_0(%arg0: i32) -> (i32, i32, i32) {
    %c0_i32 = arith.constant 0 : i32
    %c0_i32_0 = arith.constant 0 : i32
    %c0_i32_1 = arith.constant 0 : i32
    %c0_i32_2 = arith.constant 0 : i32
    return %c0_i32, %c0_i32_0, %c0_i32_1 : i32, i32, i32
  }
  func.func @transform_1(%arg0: i32) -> (i32, i32) {
    %c0_i32 = arith.constant 0 : i32
    %c0_i32_0 = arith.constant 0 : i32
    %c0_i32_1 = arith.constant 0 : i32
    return %c0_i32, %c0_i32_0 : i32, i32
  }
  func.func @transform_2(%arg0: i32) -> (i32, i32) {
    %c0_i32 = arith.constant 0 : i32
    %c0_i32_0 = arith.constant 0 : i32
    %c0_i32_1 = arith.constant 0 : i32
    return %c0_i32, %c0_i32_0 : i32, i32
  }
  func.func @transform_3(%arg0: i32) -> (i32, i32) {
    %c0_i32 = arith.constant 0 : i32
    %c0_i32_0 = arith.constant 0 : i32
    %c0_i32_1 = arith.constant 0 : i32
    return %c0_i32, %c0_i32_0 : i32, i32
  }
  func.func @transform_4(%arg0: i32) -> (i32, i32) {
    %c0_i32 = arith.constant 0 : i32
    %c0_i32_0 = arith.constant 0 : i32
    %c0_i32_1 = arith.constant 0 : i32
    return %c0_i32, %c0_i32_0 : i32, i32
  }
  func.func @transform_5(%arg0: i32) -> (i32, i32) {
    %c0_i32 = arith.constant 0 : i32
    %c0_i32_0 = arith.constant 0 : i32
    %c0_i32_1 = arith.constant 0 : i32
    return %c0_i32, %c0_i32_0 : i32, i32
  }
  func.func @transform_6(%arg0: i32) -> (i32, i32) {
    %c0_i32 = arith.constant 0 : i32
    %c0_i32_0 = arith.constant 0 : i32
    %c0_i32_1 = arith.constant 0 : i32
    return %c0_i32, %c0_i32_0 : i32, i32
  }
  func.func @transform_7(%arg0: i32) -> (i32, i32) {
    %c0_i32 = arith.constant 0 : i32
    %c0_i32_0 = arith.constant 0 : i32
    %c0_i32_1 = arith.constant 0 : i32
    return %c0_i32, %c0_i32_0 : i32, i32
  }
  func.func @transform_8(%arg0: i32) -> (i32, i32) {
    %c0_i32 = arith.constant 0 : i32
    %c0_i32_0 = arith.constant 0 : i32
    %c0_i32_1 = arith.constant 0 : i32
    return %c0_i32, %c0_i32_0 : i32, i32
  }
  func.func @transform_9(%arg0: i32) -> (i32, i32, i32) {
    %c0_i32 = arith.constant 0 : i32
    %c0_i32_0 = arith.constant 0 : i32
    %c0_i32_1 = arith.constant 0 : i32
    %c0_i32_2 = arith.constant 0 : i32
    return %c0_i32, %c0_i32_0, %c0_i32_1 : i32, i32, i32
  }
}

</mosaic_0001>

<bundles_post_ra>
// kernel: tpu_custom_call.1
= control target key start
LH: loop header
LB: loop body
LE: loop exit
PB: predicated region body
PF: predicated region fallthrough
CT: control target
= control target key end

     0   :  { %14 = vsyncpa [#allocation4], 0  ;;  %s2378_s0 = inlined_call_operand.hbm [shape: f32[2,8,16], index: 0, kind: input, shape index: {}]   ;;  %s2379_s1 = inlined_call_operand.hbm [shape: f32[16,128], index: 1, kind: input, shape index: {}]   ;;  %s2380_s2 = inlined_call_operand.vmem [shape: f32[32,128], index: 2, kind: input, shape index: {}]   ;;  %s2381_s3 = inlined_call_operand.vmem [shape: f32[1,128], index: 3, kind: input, shape index: {}]   ;;  %s2382_s4 = inlined_call_operand.hbm [shape: f32[32,128], index: 4, kind: input, shape index: {}]   ;;  %s2383_s5 = inlined_call_operand.vmem [shape: f32[32,128], index: 5, kind: input, shape index: {}]   ;;  %s2384_s6 = inlined_call_operand.vmem [shape: f32[1,128], index: 6, kind: input, shape index: {}]   ;;  %s2385_s7 = inlined_call_operand.vmem [shape: f32[32,16], index: 7, kind: input, shape index: {}]   ;;  %s2386_s8 = inlined_call_operand.vmem [shape: f32[1,16], index: 8, kind: input, shape index: {}]   ;;  %s2387_s9 = inlined_call_operand.hbm [shape: f32[2,8,16], index: 9, kind: output, shape index: {}]  }
   0x1   :  { %15 = vsyncpa [#allocation7], 0 }
   0x2   :  { %16 = vsyncpa [#allocation5], 0  ;;  %s1892_s30 = smov [#allocation6]   ;;  %s1893_s11 = smov [#allocation3]  }
   0x3   :  { %s34_s10 = sshll.u32 %s1892_s30, 4  ;;  %s22_s12 = sshll.u32 %s1893_s11, 4  ;;  %s35_s10 = int_to_ptr.vmem [resolvable:$true] %s34_s10  ;;  %s1952_s12 = int_to_ptr.vmem [resolvable:$true] %s22_s12 }
   0x4   :  { %s1798_s15 = scalar_lea.hbm %s2379_s1, 256 }
   0x5   :  { %p1799_p0 = scmp.ne.s32.totalorder %s2379_s1, %s1798_s15  ;;  %p1802_p1 = scmp.lt.u32.totalorder %s1798_s15, %s2379_s1 }
   0x7   :  { %p1804_p2 = pnand %p1802_p1, %p1799_p0 }
   0x9   :  { %1807 = shalt.err (!%p1804_p2)
}
   0xa   :  { %s1808_s20 = scalar_lea.vmem %s35_s10, 256  ;;  %p1813_p4 = scmp.lt.s32.totalorder %s35_s10, %s35_s10 }
   0xb   :  { %p1809_p3 = scmp.ne.s32.totalorder %s35_s10, %s1808_s20  ;;  %p1814_p5 = scmp.lt.s32.totalorder %s1808_s20, %s1808_s20 }
   0xd   :  { %p1815_p6 = por %p1814_p5, %p1813_p4 }
   0xf   :  { %p1816_p7 = pnand %p1815_p6, %p1809_p3 }
  0x11   :  { %1819 = shalt.err (!%p1816_p7)
}
  0x12   :  { %s1894_s21 = smov 128   ;;  %s1895_s22 = smov 8  }
  0x13   :  { %40 = dma.hbm_to_vmem [thread:$0]  %s2379_s1, 256, %s35_s10, [#allocation7], %s1894_s21, %s1894_s21, %s1895_s22  }
  0x14   :  { %s1820_s27 = scalar_lea.hbm %s2378_s0, 256 }
  0x15   :  { %p1821_p8 = scmp.ne.s32.totalorder %s2378_s0, %s1820_s27  ;;  %p1824_p9 = scmp.lt.u32.totalorder %s1820_s27, %s2378_s0 }
  0x17   :  { %p1826_p10 = pnand %p1824_p9, %p1821_p8 }
  0x19   :  { %1829 = shalt.err (!%p1826_p10)
}
  0x1a   :  { %s1830_s13 = scalar_lea.vmem %s1952_s12, 256  ;;  %p1835_p12 = scmp.lt.s32.totalorder %s1952_s12, %s1952_s12 }
  0x1b   :  { %p1831_p11 = scmp.ne.s32.totalorder %s1952_s12, %s1830_s13  ;;  %p1836_p13 = scmp.lt.s32.totalorder %s1830_s13, %s1830_s13 }
  0x1d   :  { %p1837_p0 = por %p1836_p13, %p1835_p12 }
  0x1f   :  { %p1838_p1 = pnand %p1837_p0, %p1831_p11 }
  0x21   :  { %1841 = shalt.err (!%p1838_p1)
}
  0x22   :  { %28 = dma.hbm_to_vmem [thread:$0]  %s2378_s0, 256, %s1952_s12, [#allocation4], %s1894_s21, %s1894_s21, %s1895_s22  }
  0x23   :  { %s1896_s14 = smov [#allocation8]   ;;  %s1842_s18 = scalar_lea.hbm %s2382_s4, 512 }
  0x24   :  { %s50_s15 = sshll.u32 %s1896_s14, 4  ;;  %p1843_p2 = scmp.ne.s32.totalorder %s2382_s4, %s1842_s18  ;;  %s51_s15 = int_to_ptr.vmem [resolvable:$true] %s50_s15 }
  0x25   :  { %p1846_p3 = scmp.lt.u32.totalorder %s1842_s18, %s2382_s4 }
  0x27   :  { %p1848_p4 = pnand %p1846_p3, %p1843_p2 }
  0x29   :  { %1851 = shalt.err (!%p1848_p4)
}
  0x2a   :  { %s1852_s25 = scalar_lea.vmem %s51_s15, 512  ;;  %p1857_p6 = scmp.lt.s32.totalorder %s51_s15, %s51_s15 }
  0x2b   :  { %p1853_p5 = scmp.ne.s32.totalorder %s51_s15, %s1852_s25  ;;  %p1858_p7 = scmp.lt.s32.totalorder %s1852_s25, %s1852_s25 }
  0x2d   :  { %p1859_p8 = por %p1858_p7, %p1857_p6 }
  0x2f   :  { %p1860_p9 = pnand %p1859_p8, %p1853_p5 }
  0x31   :  { %1863 = shalt.err (!%p1860_p9)
}
  0x32   :  { %56 = dma.hbm_to_vmem [thread:$0]  %s2382_s4, 512, %s51_s15, [#allocation7], %s1894_s21, %s1894_s21, %s1895_s22  }
  0x33   :  { %1886 = dma.done.wait [#allocation4], 256  }
  0x34   :  { %1887 = vsyncadd [#allocation4], 4294967040 }
  0x35   :  { %1888 = dma.done.wait [#allocation7], 768  }
  0x36   :  { %1889 = vsyncadd [#allocation7], 4294966528  ;;  %v1897_v0 = vmov 0.0   ;;  %vm1898_vm0 = vmmov 0   ;;  %v115_v1 = vld [vmem:[#allocation6] sm:$0xff]  ;;  %v116_v2 = vld [vmem:[#allocation6 + $0x8] sm:$0xff]  ;;  %v109_v39 = vlaneseq }
  0x37   :  { %1526 = vmatprep.subr.bf16.mxu0 %v1897_v0  ;;  %1528 = vmatprep.mubr.msk.bf16.mxu0 %vm1898_vm0, %v1897_v0  ;;  %v112_v3 = vld [vmem:[#allocation3] sm:$0xff]  ;;  %v117_v4 = vpack.c.bf16 %v116_v2, %v115_v1  ;;  %v113_v5 = vld [vmem:[#allocation3 + $0x8] sm:$0xff]  ;;  %vm125_vm1 = vcmask 130048   ;;  %v1441_v7 = vld [vmem:[%s2381_s3] ss:$0 sm:$0xff]  ;;  %vm173_vm2 = vcmask 1040384  }
  0x38   :  { %1532 = vmatprep.subr.bf16.mxu1 %v1897_v0  ;;  %1536 = vmatprep.mubr.msk.bf16.mxu1 %vm1898_vm0, %v1897_v0  ;;  %v114_v6 = vpack.c.bf16 %v113_v5, %v112_v3  ;;  %v2039_v40 = vand.u32 127, %v109_v39  ;;  %s1899_s3 = smov 96   ;;  %v75_v47 = vld [vmem:[%s2380_s2] sm:$0xff]  ;;  %v76_v48 = vld [vmem:[%s2380_s2 + $0x8] sm:$0xff]  ;;  %v77_v49 = vld [vmem:[%s2380_s2 + $0x10] sm:$0xff]  ;;  %s1900_s14 = smov 64  }
  0x39   :  { %1527 = vmatpush3.bf16.msra.mxu0 %v117_v4  ;;  %v2054_v50 = vpack.c.bf16 %v76_v48, %v75_v47  ;;  %v78_v51 = vld [vmem:[%s2380_s2 + $0x18] sm:$0xff]  ;;  %vm203_vm4 = vcmask 261120   ;;  %vm817_vm5 = vcmask 253952   ;;  %vm819_vm6 = vcmask 254977   ;;  %s1901_s29 = smov [#allocation9]  }
  0x3a   :  { %1540 = vmatprep.subr.bf16.mxu0 %v1897_v0  ;;  %vm111_vm3 = vcmp.lt.s32.totalorder %v2039_v40, 96  ;;  %v2060_v52 = vpack.c.bf16 %v78_v51, %v77_v49  ;;  %s1427_s30 = sshll.u32 %s1901_s29, 4  ;;  %s1428_s30 = int_to_ptr.vmem [resolvable:$true] %s1427_s30 }
  0x3b   :  { %1533 = vmatpush3.bf16.msra.mxu1 %v2054_v50  ;;  %s1864_s11 = scalar_lea.vmem %s1428_s30, 256  ;;  %p1869_p11 = scmp.lt.s32.totalorder %s1428_s30, %s1428_s30 }
  0x3c   :  { %1529 = vmatmul.mubr.msk.bf16.vlgmr.msra.gmra.mrb[0].mxu0 %vm125_vm1, %v114_v6  ;;  %1534 = vmatprep.subr.bf16.mxu1 %v1897_v0  ;;  %p1865_p10 = scmp.ne.s32.totalorder %s1428_s30, %s1864_s11  ;;  %p1870_p12 = scmp.lt.s32.totalorder %s1864_s11, %s1864_s11 }
  0x3d   :  { %1544 = vmatprep.mubr.msk.bf16.mxu0 %vm1898_vm0, %v1897_v0  ;;  %1541 = vmatpush3.bf16.msra.mxu0 %v2054_v50 }
  0x3e   :  { %1542 = vmatprep.subr.bf16.mxu0 %v1897_v0  ;;  %p1871_p13 = por %p1870_p12, %p1869_p11 }
  0x3f   :  { %1535 = vmatpush3.bf16.msra.mxu1 %v2060_v52 }
  0x40   :  { %1548 = vmatprep.subr.bf16.mxu1 %v1897_v0  ;;  %p1872_p0 = pnand %p1871_p13, %p1865_p10 }
  0x41   :  { %1543 = vmatpush3.bf16.msra.mxu0 %v2060_v52 }
  0x42   :  { %1556 = vmatprep.subr.bf16.mxu0 %v1897_v0 }
 0x10f   :  { %v163_v8 = vpop.f32.mrb[0].mxu0 }
 0x110   :  { %v164_v9 = vadd.f32 %v1441_v7, %v163_v8  ;;  %v1530_v10 = vpop.f32.mrb[1].mxu0 }
 0x111   :  { %v166_v11 = vpop.f32.mrb[2].mxu0 }
 0x112   :  { %v167_v12 = vadd.f32 %v1441_v7, %v166_v11  ;;  %v1531_v13 = vpop.f32.mrb[3].mxu0  ;;  %v196_v14 = vrot.slane %v164_v9, 1  ;;  %v273_v15 = vrot.slane %v164_v9, 2  ;;  %v351_v16 = vrot.slane %v164_v9, 3 }
 0x113   :  { %v429_v17 = vrot.slane %v164_v9, 4  ;;  %v507_v18 = vrot.slane %v164_v9, 5  ;;  %v585_v19 = vrot.slane %v164_v9, 6  ;;  %v663_v31 = vrot.slane %v164_v9, 7 }
 0x114   :  { %v171_v20 = vrot.slane %v167_v12, 7  ;;  %v2018_v21 = vsel %vm173_vm2, %v196_v14, %v167_v12  ;;  %v275_v22 = vrot.slane %v167_v12, 1  ;;  %v353_v23 = vrot.slane %v167_v12, 2 }
 0x115   :  { %v431_v24 = vrot.slane %v167_v12, 3  ;;  %v509_v25 = vrot.slane %v167_v12, 4  ;;  %v587_v26 = vrot.slane %v167_v12, 5  ;;  %v665_v27 = vrot.slane %v167_v12, 6 }
 0x116   :  { %v174_v28 = vsel %vm173_vm2, %v164_v9, %v171_v20  ;;  %v2022_v29 = vsel %vm173_vm2, %v273_v15, %v275_v22  ;;  %v2025_v30 = vsel %vm173_vm2, %v351_v16, %v353_v23 }
 0x117   :  { %v1443_v32 = vmul.f32 -1.442695, %v174_v28  ;;  %v2028_v33 = vsel %vm173_vm2, %v429_v17, %v431_v24  ;;  %v2031_v34 = vsel %vm173_vm2, %v507_v18, %v509_v25  ;;  %v2034_v35 = vsel %vm173_vm2, %v585_v19, %v587_v26 }
 0x118   :  { %v2037_v36 = vsel %vm173_vm2, %v663_v31, %v665_v27 }
 0x119   :  { %1670 = vpow2.f32 %v1443_v32 }
 0x11a   :  { %1672 = vtanh.f32 %v174_v28 }
 0x123   :  { %v1671_v37 = vpop.eup %1670 }
 0x124   :  { %v178_v38 = vadd.f32 1.0, %v1671_v37  ;;  %v1673_v41 = vpop.eup %1672 }
 0x126   :  { %1674 = vrcp.f32 %v178_v38 }
 0x130   :  { %v1675_v42 = vpop.eup %1674 }
 0x131   :  { %v182_v43 = vsel %vm111_vm3, %v1675_v42, %v1673_v41 }
 0x132   :  { %v183_v44 = vmul.f32 0.0, %v182_v43 }
 0x134   :  { %185 = vrot.lane.b32.xlu0 %v183_v44, %s1899_s3 }
 0x1a6   :  { %v186_v45 = vpop.permute.xlu0 %185 }
 0x1a7   :  { %v188_v46 = vadd.f32 %v186_v45, %v183_v44 }
 0x1a9   :  { %1676 = vtanh.f32 %v188_v46 }
 0x1b3   :  { %v1677_v53 = vpop.eup %1676 }
 0x1b4   :  { %191 = vrot.lane.b32.xlu0 %v1677_v53, %s1900_s14 }
 0x226   :  { %v192_v54 = vpop.permute.xlu0 %191 }
 0x227   :  { %v194_v55 = vmul.f32 %v192_v54, %v182_v43 }
 0x229   :  { %v199_v56 = vpack.c.bf16 %v194_v55, %v194_v55 }
 0x22b   :  { %201 = vrot.lane.b32.xlu1 %v199_v56, %s1900_s14 }
 0x22f   :  { %258 = vrot.lane.b32.xlu1 %v182_v43, %s1900_s14 }
 0x29d   :  { %v202_v57 = vpop.permute.xlu1 %201 }
 0x29e   :  { %1537 = vmatmul.mubr.msk.bf16.vlgmr.msra.gmra.mrb[0].mxu1 %vm203_vm4, %v202_v57 }
 0x29f   :  { %1549 = vmatpush3.bf16.msra.mxu1 %v2054_v50  ;;  %1552 = vmatprep.mubr.msk.bf16.mxu1 %vm1898_vm0, %v1897_v0 }
 0x2a0   :  { %1550 = vmatprep.subr.bf16.mxu1 %v1897_v0 }
 0x2a1   :  { %v259_v5 = vpop.permute.xlu1 %258 }
 0x2a3   :  { %1551 = vmatpush3.bf16.msra.mxu1 %v2060_v52 }
 0x2a4   :  { %1564 = vmatprep.subr.bf16.mxu1 %v1897_v0 }
 0x371   :  { %v241_v58 = vpop.f32.mrb[0].mxu1 }
 0x372   :  { %v247_v59 = vadd.f32 %v241_v58, %v2018_v21  ;;  %v1538_v60 = vpop.f32.mrb[1].mxu1 }
 0x373   :  { %v244_v61 = vpop.f32.mrb[2].mxu1 }
 0x374   :  { %v1445_v62 = vmul.f32 -1.442695, %v247_v59  ;;  %v1539_v63 = vpop.f32.mrb[3].mxu1 }
 0x376   :  { %1678 = vpow2.f32 %v1445_v62 }
 0x377   :  { %1680 = vtanh.f32 %v247_v59 }
 0x380   :  { %v1679_v1 = vpop.eup %1678 }
 0x381   :  { %v251_v2 = vadd.f32 1.0, %v1679_v1  ;;  %v1681_v3 = vpop.eup %1680 }
 0x383   :  { %1682 = vrcp.f32 %v251_v2 }
 0x38d   :  { %v1683_v4 = vpop.eup %1682 }
 0x38e   :  { %v255_v6 = vsel %vm111_vm3, %v1683_v4, %v1681_v3 }
 0x38f   :  { %v261_v7 = vmul.f32 %v259_v5, %v255_v6  ;;  %v256_v8 = vmul.f32 %v255_v6, %v188_v46 }
 0x391   :  { %263 = vrot.lane.b32.xlu0 %v261_v7, %s1899_s3 }
 0x403   :  { %v264_v9 = vpop.permute.xlu0 %263 }
 0x404   :  { %v266_v10 = vadd.f32 %v264_v9, %v256_v8 }
 0x406   :  { %1684 = vtanh.f32 %v266_v10 }
 0x410   :  { %v1685_v11 = vpop.eup %1684 }
 0x411   :  { %269 = vrot.lane.b32.xlu1 %v1685_v11, %s1900_s14 }
 0x415   :  { %336 = vrot.lane.b32.xlu1 %v255_v6, %s1900_s14 }
 0x483   :  { %v270_v12 = vpop.permute.xlu1 %269 }
 0x484   :  { %v272_v13 = vmul.f32 %v270_v12, %v255_v6 }
 0x486   :  { %v278_v14 = vpack.c.bf16 %v272_v13, %v272_v13 }
 0x487   :  { %v337_v26 = vpop.permute.xlu1 %336 }
 0x488   :  { %280 = vrot.lane.b32.xlu0 %v278_v14, %s1900_s14 }
 0x4fa   :  { %v281_v15 = vpop.permute.xlu0 %280 }
 0x4fb   :  { %1545 = vmatmul.mubr.msk.bf16.vlgmr.msra.gmra.mrb[4].mxu0 %vm203_vm4, %v281_v15 }
 0x4fc   :  { %1557 = vmatpush3.bf16.msra.mxu0 %v2054_v50  ;;  %1560 = vmatprep.mubr.msk.bf16.mxu0 %vm1898_vm0, %v1897_v0 }
 0x4fd   :  { %1558 = vmatprep.subr.bf16.mxu0 %v1897_v0 }
 0x500   :  { %1559 = vmatpush3.bf16.msra.mxu0 %v2060_v52 }
 0x501   :  { %1572 = vmatprep.subr.bf16.mxu0 %v1897_v0 }
 0x5ce   :  { %v319_v16 = vpop.f32.mrb[4].mxu0 }
 0x5cf   :  { %v325_v17 = vadd.f32 %v319_v16, %v2022_v29  ;;  %v1546_v18 = vpop.f32.mrb[5].mxu0 }
 0x5d0   :  { %v322_v19 = vpop.f32.mrb[6].mxu0 }
 0x5d1   :  { %v1447_v20 = vmul.f32 -1.442695, %v325_v17  ;;  %v1547_v21 = vpop.f32.mrb[7].mxu0 }
 0x5d3   :  { %1686 = vpow2.f32 %v1447_v20 }
 0x5d4   :  { %1688 = vtanh.f32 %v325_v17 }
 0x5dd   :  { %v1687_v22 = vpop.eup %1686 }
 0x5de   :  { %v329_v23 = vadd.f32 1.0, %v1687_v22  ;;  %v1689_v24 = vpop.eup %1688 }
 0x5e0   :  { %1690 = vrcp.f32 %v329_v23 }
 0x5ea   :  { %v1691_v25 = vpop.eup %1690 }
 0x5eb   :  { %v333_v27 = vsel %vm111_vm3, %v1691_v25, %v1689_v24 }
 0x5ec   :  { %v339_v28 = vmul.f32 %v337_v26, %v333_v27  ;;  %v334_v31 = vmul.f32 %v333_v27, %v266_v10 }
 0x5ee   :  { %341 = vrot.lane.b32.xlu0 %v339_v28, %s1899_s3 }
 0x660   :  { %v342_v29 = vpop.permute.xlu0 %341 }
 0x661   :  { %v344_v32 = vadd.f32 %v342_v29, %v334_v31 }
 0x663   :  { %1692 = vtanh.f32 %v344_v32 }
 0x66d   :  { %v1693_v37 = vpop.eup %1692 }
 0x66e   :  { %347 = vrot.lane.b32.xlu1 %v1693_v37, %s1900_s14 }
 0x672   :  { %414 = vrot.lane.b32.xlu1 %v333_v27, %s1900_s14 }
 0x6e0   :  { %v348_v38 = vpop.permute.xlu1 %347 }
 0x6e1   :  { %v350_v39 = vmul.f32 %v348_v38, %v333_v27 }
 0x6e3   :  { %v356_v41 = vpack.c.bf16 %v350_v39, %v350_v39 }
 0x6e4   :  { %v415_v55 = vpop.permute.xlu1 %414 }
 0x6e5   :  { %358 = vrot.lane.b32.xlu0 %v356_v41, %s1900_s14 }
 0x757   :  { %v359_v42 = vpop.permute.xlu0 %358 }
 0x758   :  { %1553 = vmatmul.mubr.msk.bf16.vlgmr.msra.gmra.mrb[4].mxu1 %vm203_vm4, %v359_v42 }
 0x759   :  { %1565 = vmatpush3.bf16.msra.mxu1 %v2054_v50  ;;  %1568 = vmatprep.mubr.msk.bf16.mxu1 %vm1898_vm0, %v1897_v0 }
 0x75a   :  { %1566 = vmatprep.subr.bf16.mxu1 %v1897_v0 }
 0x75d   :  { %1567 = vmatpush3.bf16.msra.mxu1 %v2060_v52 }
 0x75e   :  { %1580 = vmatprep.subr.bf16.mxu1 %v1897_v0 }
 0x82b   :  { %v397_v43 = vpop.f32.mrb[4].mxu1 }
 0x82c   :  { %v403_v44 = vadd.f32 %v397_v43, %v2025_v30  ;;  %v1554_v45 = vpop.f32.mrb[5].mxu1 }
 0x82d   :  { %v400_v46 = vpop.f32.mrb[6].mxu1 }
 0x82e   :  { %v1449_v47 = vmul.f32 -1.442695, %v403_v44  ;;  %v1555_v48 = vpop.f32.mrb[7].mxu1 }
 0x830   :  { %1694 = vpow2.f32 %v1449_v47 }
 0x831   :  { %1696 = vtanh.f32 %v403_v44 }
 0x83a   :  { %v1695_v49 = vpop.eup %1694 }
 0x83b   :  { %v407_v51 = vadd.f32 1.0, %v1695_v49  ;;  %v1697_v53 = vpop.eup %1696 }
 0x83d   :  { %1698 = vrcp.f32 %v407_v51 }
 0x847   :  { %v1699_v54 = vpop.eup %1698 }
 0x848   :  { %v411_v56 = vsel %vm111_vm3, %v1699_v54, %v1697_v53 }
 0x849   :  { %v417_v57 = vmul.f32 %v415_v55, %v411_v56  ;;  %v412_v58 = vmul.f32 %v411_v56, %v344_v32 }
 0x84b   :  { %419 = vrot.lane.b32.xlu0 %v417_v57, %s1899_s3 }
 0x8bd   :  { %v420_v30 = vpop.permute.xlu0 %419 }
 0x8be   :  { %v422_v59 = vadd.f32 %v420_v30, %v412_v58 }
 0x8c0   :  { %1700 = vtanh.f32 %v422_v59 }
 0x8ca   :  { %v1701_v60 = vpop.eup %1700 }
 0x8cb   :  { %425 = vrot.lane.b32.xlu1 %v1701_v60, %s1900_s14 }
 0x8cf   :  { %492 = vrot.lane.b32.xlu1 %v411_v56, %s1900_s14 }
 0x93d   :  { %v426_v61 = vpop.permute.xlu1 %425 }
 0x93e   :  { %v428_v62 = vmul.f32 %v426_v61, %v411_v56 }
 0x940   :  { %v434_v63 = vpack.c.bf16 %v428_v62, %v428_v62 }
 0x941   :  { %v493_v12 = vpop.permute.xlu1 %492 }
 0x942   :  { %436 = vrot.lane.b32.xlu0 %v434_v63, %s1900_s14 }
 0x9b4   :  { %v437_v1 = vpop.permute.xlu0 %436 }
 0x9b5   :  { %1561 = vmatmul.mubr.msk.bf16.vlgmr.msra.gmra.mrb[8].mxu0 %vm203_vm4, %v437_v1 }
 0x9b6   :  { %1573 = vmatpush3.bf16.msra.mxu0 %v2054_v50  ;;  %1576 = vmatprep.mubr.msk.bf16.mxu0 %vm1898_vm0, %v1897_v0 }
 0x9b7   :  { %1574 = vmatprep.subr.bf16.mxu0 %v1897_v0 }
 0x9ba   :  { %1575 = vmatpush3.bf16.msra.mxu0 %v2060_v52 }
 0x9bb   :  { %1588 = vmatprep.subr.bf16.mxu0 %v1897_v0 }
 0xa88   :  { %v475_v2 = vpop.f32.mrb[8].mxu0 }
 0xa89   :  { %v481_v3 = vadd.f32 %v475_v2, %v2028_v33  ;;  %v1562_v4 = vpop.f32.mrb[9].mxu0 }
 0xa8a   :  { %v478_v5 = vpop.f32.mrb[10].mxu0 }
 0xa8b   :  { %v1451_v6 = vmul.f32 -1.442695, %v481_v3  ;;  %v1563_v7 = vpop.f32.mrb[11].mxu0 }
 0xa8d   :  { %1702 = vpow2.f32 %v1451_v6 }
 0xa8e   :  { %1704 = vtanh.f32 %v481_v3 }
 0xa97   :  { %v1703_v8 = vpop.eup %1702 }
 0xa98   :  { %v485_v9 = vadd.f32 1.0, %v1703_v8  ;;  %v1705_v10 = vpop.eup %1704 }
 0xa9a   :  { %1706 = vrcp.f32 %v485_v9 }
 0xaa4   :  { %v1707_v11 = vpop.eup %1706 }
 0xaa5   :  { %v489_v13 = vsel %vm111_vm3, %v1707_v11, %v1705_v10 }
 0xaa6   :  { %v495_v14 = vmul.f32 %v493_v12, %v489_v13  ;;  %v490_v15 = vmul.f32 %v489_v13, %v422_v59 }
 0xaa8   :  { %497 = vrot.lane.b32.xlu0 %v495_v14, %s1899_s3 }
 0xb1a   :  { %v498_v33 = vpop.permute.xlu0 %497 }
 0xb1b   :  { %v500_v16 = vadd.f32 %v498_v33, %v490_v15 }
 0xb1d   :  { %1708 = vtanh.f32 %v500_v16 }
 0xb27   :  { %v1709_v17 = vpop.eup %1708 }
 0xb28   :  { %503 = vrot.lane.b32.xlu1 %v1709_v17, %s1900_s14 }
 0xb2c   :  { %570 = vrot.lane.b32.xlu1 %v489_v13, %s1900_s14 }
 0xb9a   :  { %v504_v18 = vpop.permute.xlu1 %503 }
 0xb9b   :  { %v506_v19 = vmul.f32 %v504_v18, %v489_v13  ;;  %v81_v18 = vld [vmem:[#allocation8] sm:$0xff] }
 0xb9d   :  { %v512_v20 = vpack.c.bf16 %v506_v19, %v506_v19  ;;  %v82_v19 = vld [vmem:[#allocation8 + $0x8] sm:$0xff] }
 0xb9e   :  { %v571_v32 = vpop.permute.xlu1 %570 }
 0xb9f   :  { %514 = vrot.lane.b32.xlu0 %v512_v20, %s1900_s14  ;;  %v85_v20 = vld [vmem:[%s2383_s5] sm:$0xff] }
 0xc11   :  { %v515_v21 = vpop.permute.xlu0 %514 }
 0xc12   :  { %1569 = vmatmul.mubr.msk.bf16.vlgmr.msra.gmra.mrb[8].mxu1 %vm203_vm4, %v515_v21  ;;  %v86_v21 = vld [vmem:[%s2383_s5 + $0x8] sm:$0xff] }
 0xc13   :  { %1581 = vmatpush3.bf16.msra.mxu1 %v2054_v50  ;;  %1584 = vmatprep.mubr.msk.bf16.mxu1 %vm1898_vm0, %v1897_v0 }
 0xc14   :  { %1582 = vmatprep.subr.bf16.mxu1 %v1897_v0 }
 0xc17   :  { %1583 = vmatpush3.bf16.msra.mxu1 %v2060_v52 }
 0xc18   :  { %1596 = vmatprep.subr.bf16.mxu1 %v1897_v0 }
 0xce5   :  { %v553_v22 = vpop.f32.mrb[8].mxu1 }
 0xce6   :  { %v559_v23 = vadd.f32 %v553_v22, %v2031_v34  ;;  %v1570_v24 = vpop.f32.mrb[9].mxu1  ;;  %v89_v22 = vadd.f32 %v85_v20, %v81_v18 }
 0xce7   :  { %v556_v25 = vpop.f32.mrb[10].mxu1  ;;  %v84_v24 = vld [vmem:[#allocation8 + $0x18] sm:$0xff] }
 0xce8   :  { %v1453_v26 = vmul.f32 -1.442695, %v559_v23  ;;  %v1571_v27 = vpop.f32.mrb[11].mxu1  ;;  %v90_v25 = vadd.f32 %v86_v21, %v82_v19 }
 0xce9   :  { %v88_v27 = vld [vmem:[%s2383_s5 + $0x18] sm:$0xff] }
 0xcea   :  { %1710 = vpow2.f32 %v1453_v26  ;;  %v87_v26 = vld [vmem:[%s2383_s5 + $0x10] sm:$0xff] }
 0xceb   :  { %1712 = vtanh.f32 %v559_v23  ;;  %v83_v23 = vld [vmem:[#allocation8 + $0x10] sm:$0xff] }
 0xcf4   :  { %v1711_v28 = vpop.eup %1710 }
 0xcf5   :  { %v563_v31 = vadd.f32 1.0, %v1711_v28  ;;  %v1713_v50 = vpop.eup %1712  ;;  %v91_v28 = vadd.f32 %v87_v26, %v83_v23 }
 0xcf7   :  { %1714 = vrcp.f32 %v563_v31  ;;  %v92_v31 = vadd.f32 %v88_v27, %v84_v24 }
 0xd01   :  { %v1715_v29 = vpop.eup %1714 }
 0xd02   :  { %v567_v52 = vsel %vm111_vm3, %v1715_v29, %v1713_v50  ;;  %v2171_v50 = vpack.c.bf16 %v90_v25, %v89_v22  ;;  %v2174_v29 = vpack.c.bf16 %v92_v31, %v91_v28 }
 0xd03   :  { %v573_v37 = vmul.f32 %v571_v32, %v567_v52  ;;  %v568_v38 = vmul.f32 %v567_v52, %v500_v16 }
 0xd05   :  { %575 = vrot.lane.b32.xlu0 %v573_v37, %s1899_s3 }
 0xd77   :  { %v576_v34 = vpop.permute.xlu0 %575 }
 0xd78   :  { %v578_v39 = vadd.f32 %v576_v34, %v568_v38 }
 0xd7a   :  { %1716 = vtanh.f32 %v578_v39 }
 0xd84   :  { %v1717_v41 = vpop.eup %1716 }
 0xd85   :  { %581 = vrot.lane.b32.xlu1 %v1717_v41, %s1900_s14 }
 0xd89   :  { %648 = vrot.lane.b32.xlu1 %v567_v52, %s1900_s14 }
 0xdf7   :  { %v582_v42 = vpop.permute.xlu1 %581 }
 0xdf8   :  { %v584_v43 = vmul.f32 %v582_v42, %v567_v52 }
 0xdfa   :  { %v590_v44 = vpack.c.bf16 %v584_v43, %v584_v43 }
 0xdfb   :  { %v649_v58 = vpop.permute.xlu1 %648 }
 0xdfc   :  { %592 = vrot.lane.b32.xlu0 %v590_v44, %s1900_s14 }
 0xe6e   :  { %v593_v45 = vpop.permute.xlu0 %592 }
 0xe6f   :  { %1577 = vmatmul.mubr.msk.bf16.vlgmr.msra.gmra.mrb[12].mxu0 %vm203_vm4, %v593_v45 }
 0xe70   :  { %1592 = vmatprep.mubr.msk.bf16.mxu0 %vm1898_vm0, %v1897_v0  ;;  %1589 = vmatpush3.bf16.msra.mxu0 %v2171_v50 }
 0xe71   :  { %1590 = vmatprep.subr.bf16.mxu0 %v1897_v0 }
 0xe74   :  { %1591 = vmatpush3.bf16.msra.mxu0 %v2174_v29 }
 0xe75   :  { %1604 = vmatprep.subr.bf16.mxu0 %v1897_v0 }
 0xf42   :  { %v631_v46 = vpop.f32.mrb[12].mxu0 }
 0xf43   :  { %v637_v47 = vadd.f32 %v631_v46, %v2034_v35  ;;  %v1578_v48 = vpop.f32.mrb[13].mxu0 }
 0xf44   :  { %v634_v49 = vpop.f32.mrb[14].mxu0 }
 0xf45   :  { %v1455_v51 = vmul.f32 -1.442695, %v637_v47  ;;  %v1579_v53 = vpop.f32.mrb[15].mxu0 }
 0xf47   :  { %1718 = vpow2.f32 %v1455_v51 }
 0xf48   :  { %1720 = vtanh.f32 %v637_v47 }
 0xf51   :  { %v1719_v54 = vpop.eup %1718 }
 0xf52   :  { %v641_v55 = vadd.f32 1.0, %v1719_v54  ;;  %v1721_v56 = vpop.eup %1720 }
 0xf54   :  { %1722 = vrcp.f32 %v641_v55 }
 0xf5e   :  { %v1723_v57 = vpop.eup %1722 }
 0xf5f   :  { %v645_v30 = vsel %vm111_vm3, %v1723_v57, %v1721_v56 }
 0xf60   :  { %v651_v59 = vmul.f32 %v649_v58, %v645_v30  ;;  %v646_v60 = vmul.f32 %v645_v30, %v578_v39  ;;  %v2196_v39 = vld [vmem:[%s2384_s6] ss:$0 sm:$0xff] }
 0xf62   :  { %653 = vrot.lane.b32.xlu0 %v651_v59, %s1899_s3 }
 0xfd4   :  { %v654_v35 = vpop.permute.xlu0 %653 }
 0xfd5   :  { %v656_v61 = vadd.f32 %v654_v35, %v646_v60 }
 0xfd7   :  { %1724 = vtanh.f32 %v656_v61 }
 0xfe1   :  { %v1725_v62 = vpop.eup %1724 }
 0xfe2   :  { %659 = vrot.lane.b32.xlu1 %v1725_v62, %s1900_s14 }
 0xfe6   :  { %726 = vrot.lane.b32.xlu1 %v645_v30, %s1900_s14 }
0x1054   :  { %v660_v63 = vpop.permute.xlu1 %659 }
0x1055   :  { %v662_v1 = vmul.f32 %v660_v63, %v645_v30 }
0x1057   :  { %v668_v2 = vpack.c.bf16 %v662_v1, %v662_v1 }
0x1058   :  { %v727_v14 = vpop.permute.xlu1 %726 }
0x1059   :  { %670 = vrot.lane.b32.xlu0 %v668_v2, %s1900_s14 }
0x10cb   :  { %v671_v3 = vpop.permute.xlu0 %670 }
0x10cc   :  { %1585 = vmatmul.mubr.msk.bf16.vlgmr.msra.gmra.mrb[12].mxu1 %vm203_vm4, %v671_v3 }
0x10cd   :  { %1600 = vmatprep.mubr.msk.bf16.mxu1 %vm1898_vm0, %v1897_v0  ;;  %1597 = vmatpush3.bf16.msra.mxu1 %v2171_v50 }
0x10ce   :  { %1598 = vmatprep.subr.bf16.mxu1 %v1897_v0 }
0x10d1   :  { %1599 = vmatpush3.bf16.msra.mxu1 %v2174_v29 }
0x10d2   :  { %1612 = vmatprep.subr.bf16.mxu1 %v1897_v0 }
0x119f   :  { %v709_v4 = vpop.f32.mrb[12].mxu1 }
0x11a0   :  { %v715_v5 = vadd.f32 %v709_v4, %v2037_v36  ;;  %v1586_v6 = vpop.f32.mrb[13].mxu1 }
0x11a1   :  { %v712_v7 = vpop.f32.mrb[14].mxu1 }
0x11a2   :  { %v1457_v8 = vmul.f32 -1.442695, %v715_v5  ;;  %v1587_v9 = vpop.f32.mrb[15].mxu1 }
0x11a4   :  { %1726 = vpow2.f32 %v1457_v8 }
0x11a5   :  { %1728 = vtanh.f32 %v715_v5 }
0x11ae   :  { %v1727_v10 = vpop.eup %1726 }
0x11af   :  { %v719_v11 = vadd.f32 1.0, %v1727_v10  ;;  %v1729_v12 = vpop.eup %1728 }
0x11b1   :  { %1730 = vrcp.f32 %v719_v11 }
0x11bb   :  { %v1731_v13 = vpop.eup %1730 }
0x11bc   :  { %v723_v15 = vsel %vm111_vm3, %v1731_v13, %v1729_v12 }
0x11bd   :  { %v729_v33 = vmul.f32 %v727_v14, %v723_v15  ;;  %v724_v16 = vmul.f32 %v723_v15, %v656_v61 }
0x11bf   :  { %731 = vrot.lane.b32.xlu0 %v729_v33, %s1899_s3 }
0x1231   :  { %v732_v36 = vpop.permute.xlu0 %731 }
0x1232   :  { %v734_v17 = vadd.f32 %v732_v36, %v724_v16 }
0x1234   :  { %1732 = vtanh.f32 %v734_v17 }
0x123e   :  { %v1733_v32 = vpop.eup %1732 }
0x123f   :  { %737 = vrot.lane.b32.xlu1 %v1733_v32, %s1900_s14 }
0x1243   :  { %798 = vrot.lane.b32.xlu1 %v723_v15, %s1900_s14 }
0x12b1   :  { %v738_v52 = vpop.permute.xlu1 %737 }
0x12b2   :  { %v740_v37 = vmul.f32 %v738_v52, %v723_v15 }
0x12b4   :  { %v741_v38 = vpack.c.bf16 %v740_v37, %v740_v37 }
0x12b5   :  { %v799_v53 = vpop.permute.xlu1 %798 }
0x12b6   :  { %743 = vrot.lane.b32.xlu0 %v741_v38, %s1900_s14 }
0x1328   :  { %v744_v34 = vpop.permute.xlu0 %743 }
0x1329   :  { %1593 = vmatmul.mubr.msk.bf16.vlgmr.msra.gmra.mrb[16].mxu0 %vm203_vm4, %v744_v34 }
0x132a   :  { %1605 = vmatpush3.bf16.msra.mxu0 %v2171_v50  ;;  %1608 = vmatprep.mubr.msk.bf16.mxu0 %vm1898_vm0, %v1897_v0 }
0x132b   :  { %1606 = vmatprep.subr.bf16.mxu0 %v1897_v0 }
0x132e   :  { %1607 = vmatpush3.bf16.msra.mxu0 %v2174_v29 }
0x132f   :  { %1620 = vmatprep.subr.bf16.mxu0 %v1897_v0 }
0x13fc   :  { %v782_v41 = vpop.f32.mrb[16].mxu0 }
0x13fd   :  { %v783_v42 = vadd.f32 %v2196_v39, %v782_v41  ;;  %v1594_v43 = vpop.f32.mrb[17].mxu0 }
0x13fe   :  { %v785_v44 = vpop.f32.mrb[18].mxu0 }
0x13ff   :  { %v1459_v45 = vmul.f32 -1.442695, %v783_v42  ;;  %v1595_v46 = vpop.f32.mrb[19].mxu0 }
0x1401   :  { %1734 = vpow2.f32 %v1459_v45 }
0x1402   :  { %1736 = vtanh.f32 %v783_v42 }
0x140b   :  { %v1735_v47 = vpop.eup %1734 }
0x140c   :  { %v791_v48 = vadd.f32 1.0, %v1735_v47  ;;  %v1737_v49 = vpop.eup %1736 }
0x140e   :  { %1738 = vrcp.f32 %v791_v48 }
0x1418   :  { %v1739_v51 = vpop.eup %1738 }
0x1419   :  { %v795_v54 = vsel %vm111_vm3, %v1739_v51, %v1737_v49 }
0x141a   :  { %v801_v55 = vmul.f32 %v799_v53, %v795_v54  ;;  %v796_v56 = vmul.f32 %v795_v54, %v734_v17 }
0x141c   :  { %803 = vrot.lane.b32.xlu0 %v801_v55, %s1899_s3 }
0x148e   :  { %v804_v57 = vpop.permute.xlu0 %803 }
0x148f   :  { %v806_v58 = vadd.f32 %v804_v57, %v796_v56 }
0x1491   :  { %1740 = vtanh.f32 %v806_v58 }
0x149b   :  { %v1741_v30 = vpop.eup %1740 }
0x149c   :  { %809 = vrot.lane.b32.xlu1 %v1741_v30, %s1900_s14 }
0x14a0   :  { %878 = vrot.lane.b32.xlu1 %v795_v54, %s1900_s14 }
0x150e   :  { %v810_v59 = vpop.permute.xlu1 %809 }
0x150f   :  { %v2204_v60 = vmul.f32 %v810_v59, %v795_v54 }
0x1511   :  { %v821_v35 = vpack.c.bf16 %v2204_v60, %v2204_v60 }
0x1512   :  { %v879_v9 = vpop.permute.xlu1 %878 }
0x1513   :  { %823 = vrot.lane.b32.xlu0 %v821_v35, %s1900_s14 }
0x1585   :  { %v824_v61 = vpop.permute.xlu0 %823 }
0x1586   :  { %1601 = vmatmul.mubr.msk.bf16.vlgmr.msra.gmra.mrb[16].mxu1 %vm203_vm4, %v824_v61 }
0x1587   :  { %1613 = vmatpush3.bf16.msra.mxu1 %v2171_v50  ;;  %1616 = vmatprep.mubr.msk.bf16.mxu1 %vm1898_vm0, %v1897_v0 }
0x1588   :  { %1614 = vmatprep.subr.bf16.mxu1 %v1897_v0 }
0x158b   :  { %1615 = vmatpush3.bf16.msra.mxu1 %v2174_v29 }
0x158c   :  { %1628 = vmatprep.subr.bf16.mxu1 %v1897_v0 }
0x1659   :  { %v862_v62 = vpop.f32.mrb[16].mxu1 }
0x165a   :  { %v863_v63 = vadd.f32 %v2196_v39, %v862_v62  ;;  %v1602_v1 = vpop.f32.mrb[17].mxu1 }
0x165b   :  { %v865_v2 = vpop.f32.mrb[18].mxu1 }
0x165c   :  { %v1461_v3 = vmul.f32 -1.442695, %v863_v63  ;;  %v1603_v4 = vpop.f32.mrb[19].mxu1 }
0x165e   :  { %1742 = vpow2.f32 %v1461_v3 }
0x165f   :  { %1744 = vtanh.f32 %v863_v63 }
0x1668   :  { %v1743_v5 = vpop.eup %1742 }
0x1669   :  { %v871_v6 = vadd.f32 1.0, %v1743_v5  ;;  %v1745_v7 = vpop.eup %1744 }
0x166b   :  { %1746 = vrcp.f32 %v871_v6 }
0x1675   :  { %v1747_v8 = vpop.eup %1746 }
0x1676   :  { %v875_v10 = vsel %vm111_vm3, %v1747_v8, %v1745_v7 }
0x1677   :  { %v881_v11 = vmul.f32 %v879_v9, %v875_v10  ;;  %v876_v12 = vmul.f32 %v875_v10, %v806_v58 }
0x1679   :  { %883 = vrot.lane.b32.xlu0 %v881_v11, %s1899_s3 }
0x16eb   :  { %v884_v13 = vpop.permute.xlu0 %883 }
0x16ec   :  { %v886_v14 = vadd.f32 %v884_v13, %v876_v12 }
0x16ee   :  { %1748 = vtanh.f32 %v886_v14 }
0x16f8   :  { %v1749_v15 = vpop.eup %1748 }
0x16f9   :  { %889 = vrot.lane.b32.xlu1 %v1749_v15, %s1900_s14 }
0x16fd   :  { %956 = vrot.lane.b32.xlu1 %v875_v10, %s1900_s14 }
0x176b   :  { %v890_v33 = vpop.permute.xlu1 %889 }
0x176c   :  { %v2222_v16 = vmul.f32 %v890_v33, %v875_v10 }
0x176e   :  { %v899_v36 = vpack.c.bf16 %v2222_v16, %v2222_v16 }
0x176f   :  { %v957_v28 = vpop.permute.xlu1 %956 }
0x1770   :  { %901 = vrot.lane.b32.xlu0 %v899_v36, %s1900_s14 }
0x17e2   :  { %v902_v17 = vpop.permute.xlu0 %901 }
0x17e3   :  { %1609 = vmatmul.mubr.msk.bf16.vlgmr.msra.gmra.mrb[20].mxu0 %vm203_vm4, %v902_v17 }
0x17e4   :  { %1621 = vmatpush3.bf16.msra.mxu0 %v2171_v50  ;;  %1624 = vmatprep.mubr.msk.bf16.mxu0 %vm1898_vm0, %v1897_v0 }
0x17e5   :  { %1622 = vmatprep.subr.bf16.mxu0 %v1897_v0 }
0x17e8   :  { %1623 = vmatpush3.bf16.msra.mxu0 %v2174_v29 }
0x17e9   :  { %1636 = vmatprep.subr.bf16.mxu0 %v1897_v0 }
0x18b6   :  { %v940_v18 = vpop.f32.mrb[20].mxu0 }
0x18b7   :  { %v941_v19 = vadd.f32 %v2196_v39, %v940_v18  ;;  %v1610_v20 = vpop.f32.mrb[21].mxu0 }
0x18b8   :  { %v943_v21 = vpop.f32.mrb[22].mxu0 }
0x18b9   :  { %v1463_v22 = vmul.f32 -1.442695, %v941_v19  ;;  %v1611_v23 = vpop.f32.mrb[23].mxu0 }
0x18bb   :  { %1750 = vpow2.f32 %v1463_v22 }
0x18bc   :  { %1752 = vtanh.f32 %v941_v19 }
0x18c5   :  { %v1751_v24 = vpop.eup %1750 }
0x18c6   :  { %v949_v25 = vadd.f32 1.0, %v1751_v24  ;;  %v1753_v26 = vpop.eup %1752 }
0x18c8   :  { %1754 = vrcp.f32 %v949_v25 }
0x18d2   :  { %v1755_v27 = vpop.eup %1754 }
0x18d3   :  { %v953_v31 = vsel %vm111_vm3, %v1755_v27, %v1753_v26 }
0x18d4   :  { %v959_v32 = vmul.f32 %v957_v28, %v953_v31  ;;  %v954_v52 = vmul.f32 %v953_v31, %v886_v14 }
0x18d6   :  { %961 = vrot.lane.b32.xlu0 %v959_v32, %s1899_s3 }
0x1948   :  { %v962_v37 = vpop.permute.xlu0 %961 }
0x1949   :  { %v964_v38 = vadd.f32 %v962_v37, %v954_v52 }
0x194b   :  { %1756 = vtanh.f32 %v964_v38 }
0x1955   :  { %v1757_v34 = vpop.eup %1756 }
0x1956   :  { %967 = vrot.lane.b32.xlu1 %v1757_v34, %s1900_s14 }
0x195a   :  { %1034 = vrot.lane.b32.xlu1 %v953_v31, %s1900_s14 }
0x19c8   :  { %v968_v41 = vpop.permute.xlu1 %967 }
0x19c9   :  { %v2240_v42 = vmul.f32 %v968_v41, %v953_v31 }
0x19cb   :  { %v977_v43 = vpack.c.bf16 %v2240_v42, %v2240_v42 }
0x19cc   :  { %v1035_v57 = vpop.permute.xlu1 %1034 }
0x19cd   :  { %979 = vrot.lane.b32.xlu0 %v977_v43, %s1900_s14 }
0x1a3f   :  { %v980_v44 = vpop.permute.xlu0 %979 }
0x1a40   :  { %1617 = vmatmul.mubr.msk.bf16.vlgmr.msra.gmra.mrb[20].mxu1 %vm203_vm4, %v980_v44 }
0x1a41   :  { %1629 = vmatpush3.bf16.msra.mxu1 %v2171_v50  ;;  %1632 = vmatprep.mubr.msk.bf16.mxu1 %vm1898_vm0, %v1897_v0 }
0x1a42   :  { %1630 = vmatprep.subr.bf16.mxu1 %v1897_v0 }
0x1a45   :  { %1631 = vmatpush3.bf16.msra.mxu1 %v2174_v29 }
0x1a46   :  { %1644 = vmatprep.subr.bf16.mxu1 %v1897_v0 }
0x1b13   :  { %v1018_v45 = vpop.f32.mrb[20].mxu1 }
0x1b14   :  { %v1019_v46 = vadd.f32 %v2196_v39, %v1018_v45  ;;  %v1618_v47 = vpop.f32.mrb[21].mxu1 }
0x1b15   :  { %v1021_v48 = vpop.f32.mrb[22].mxu1 }
0x1b16   :  { %v1465_v49 = vmul.f32 -1.442695, %v1019_v46  ;;  %v1619_v51 = vpop.f32.mrb[23].mxu1 }
0x1b18   :  { %1758 = vpow2.f32 %v1465_v49 }
0x1b19   :  { %1760 = vtanh.f32 %v1019_v46 }
0x1b22   :  { %v1759_v53 = vpop.eup %1758 }
0x1b23   :  { %v1027_v54 = vadd.f32 1.0, %v1759_v53  ;;  %v1761_v55 = vpop.eup %1760 }
0x1b25   :  { %1762 = vrcp.f32 %v1027_v54 }
0x1b2f   :  { %v1763_v56 = vpop.eup %1762 }
0x1b30   :  { %v1031_v58 = vsel %vm111_vm3, %v1763_v56, %v1761_v55 }
0x1b31   :  { %v1037_v30 = vmul.f32 %v1035_v57, %v1031_v58  ;;  %v1032_v59 = vmul.f32 %v1031_v58, %v964_v38 }
0x1b33   :  { %1039 = vrot.lane.b32.xlu0 %v1037_v30, %s1899_s3 }
0x1ba5   :  { %v1040_v35 = vpop.permute.xlu0 %1039 }
0x1ba6   :  { %v1042_v61 = vadd.f32 %v1040_v35, %v1032_v59 }
0x1ba8   :  { %1764 = vtanh.f32 %v1042_v61 }
0x1bb2   :  { %v1765_v62 = vpop.eup %1764 }
0x1bb3   :  { %1045 = vrot.lane.b32.xlu1 %v1765_v62, %s1900_s14 }
0x1bb7   :  { %1112 = vrot.lane.b32.xlu1 %v1031_v58, %s1900_s14 }
0x1c25   :  { %v1046_v63 = vpop.permute.xlu1 %1045 }
0x1c26   :  { %v2258_v1 = vmul.f32 %v1046_v63, %v1031_v58 }
0x1c28   :  { %v1055_v2 = vpack.c.bf16 %v2258_v1, %v2258_v1 }
0x1c29   :  { %v1113_v14 = vpop.permute.xlu1 %1112 }
0x1c2a   :  { %1057 = vrot.lane.b32.xlu0 %v1055_v2, %s1900_s14 }
0x1c9c   :  { %v1058_v3 = vpop.permute.xlu0 %1057 }
0x1c9d   :  { %1625 = vmatmul.mubr.msk.bf16.vlgmr.msra.gmra.mrb[24].mxu0 %vm203_vm4, %v1058_v3 }
0x1c9e   :  { %1637 = vmatpush3.bf16.msra.mxu0 %v2171_v50  ;;  %1640 = vmatprep.mubr.msk.bf16.mxu0 %vm1898_vm0, %v1897_v0 }
0x1c9f   :  { %1638 = vmatprep.subr.bf16.mxu0 %v1897_v0 }
0x1ca2   :  { %1639 = vmatpush3.bf16.msra.mxu0 %v2174_v29 }
0x1ca3   :  { %1652 = vmatprep.subr.bf16.mxu0 %v1897_v0 }
0x1d70   :  { %v1096_v4 = vpop.f32.mrb[24].mxu0 }
0x1d71   :  { %v1097_v5 = vadd.f32 %v2196_v39, %v1096_v4  ;;  %v1626_v6 = vpop.f32.mrb[25].mxu0 }
0x1d72   :  { %v1099_v7 = vpop.f32.mrb[26].mxu0 }
0x1d73   :  { %v1467_v8 = vmul.f32 -1.442695, %v1097_v5  ;;  %v1627_v9 = vpop.f32.mrb[27].mxu0 }
0x1d75   :  { %1766 = vpow2.f32 %v1467_v8 }
0x1d76   :  { %1768 = vtanh.f32 %v1097_v5 }
0x1d7f   :  { %v1767_v10 = vpop.eup %1766 }
0x1d80   :  { %v1105_v11 = vadd.f32 1.0, %v1767_v10  ;;  %v1769_v12 = vpop.eup %1768 }
0x1d82   :  { %1770 = vrcp.f32 %v1105_v11 }
0x1d8c   :  { %v1771_v13 = vpop.eup %1770 }
0x1d8d   :  { %v1109_v15 = vsel %vm111_vm3, %v1771_v13, %v1769_v12 }
0x1d8e   :  { %v1115_v33 = vmul.f32 %v1113_v14, %v1109_v15  ;;  %v1110_v36 = vmul.f32 %v1109_v15, %v1042_v61 }
0x1d90   :  { %1117 = vrot.lane.b32.xlu0 %v1115_v33, %s1899_s3 }
0x1e02   :  { %v1118_v17 = vpop.permute.xlu0 %1117 }
0x1e03   :  { %v1120_v18 = vadd.f32 %v1118_v17, %v1110_v36 }
0x1e05   :  { %1772 = vtanh.f32 %v1120_v18 }
0x1e0f   :  { %v1773_v19 = vpop.eup %1772 }
0x1e10   :  { %1123 = vrot.lane.b32.xlu1 %v1773_v19, %s1900_s14 }
0x1e14   :  { %1190 = vrot.lane.b32.xlu1 %v1109_v15, %s1900_s14 }
0x1e82   :  { %v1124_v20 = vpop.permute.xlu1 %1123 }
0x1e83   :  { %v2276_v21 = vmul.f32 %v1124_v20, %v1109_v15 }
0x1e85   :  { %v1133_v22 = vpack.c.bf16 %v2276_v21, %v2276_v21 }
0x1e86   :  { %v1191_v38 = vpop.permute.xlu1 %1190 }
0x1e87   :  { %1135 = vrot.lane.b32.xlu0 %v1133_v22, %s1900_s14 }
0x1ef9   :  { %v1136_v23 = vpop.permute.xlu0 %1135 }
0x1efa   :  { %1633 = vmatmul.mubr.msk.bf16.vlgmr.msra.gmra.mrb[24].mxu1 %vm203_vm4, %v1136_v23 }
0x1efb   :  { %1645 = vmatpush3.bf16.msra.mxu1 %v2171_v50  ;;  %1648 = vmatprep.mubr.msk.bf16.mxu1 %vm1898_vm0, %v1897_v0 }
0x1efc   :  { %1646 = vmatprep.subr.bf16.mxu1 %v1897_v0 }
0x1eff   :  { %1647 = vmatpush3.bf16.msra.mxu1 %v2174_v29 }
0x1fcd   :  { %v1174_v24 = vpop.f32.mrb[24].mxu1 }
0x1fce   :  { %v1175_v25 = vadd.f32 %v2196_v39, %v1174_v24  ;;  %v1634_v26 = vpop.f32.mrb[25].mxu1 }
0x1fcf   :  { %v1177_v27 = vpop.f32.mrb[26].mxu1  ;;  %v95_v26 = vld [vmem:[%s2385_s7] sm:$0xff] }
0x1fd0   :  { %v1469_v28 = vmul.f32 -1.442695, %v1175_v25  ;;  %v1635_v31 = vpop.f32.mrb[27].mxu1  ;;  %v96_v27 = vld [vmem:[%s2385_s7 + $0x8] sm:$0xff] }
0x1fd1   :  { %v99_v31 = vpack.c.bf16 %v96_v27, %v95_v26 }
0x1fd2   :  { %1774 = vpow2.f32 %v1469_v28  ;;  %v97_v28 = vld [vmem:[%s2385_s7 + $0x10] sm:$0xff] }
0x1fd3   :  { %1776 = vtanh.f32 %v1175_v25 }
0x1fdc   :  { %v1775_v32 = vpop.eup %1774 }
0x1fdd   :  { %v1183_v52 = vadd.f32 1.0, %v1775_v32  ;;  %v1777_v50 = vpop.eup %1776 }
0x1fdf   :  { %1778 = vrcp.f32 %v1183_v52 }
0x1fe9   :  { %v1779_v37 = vpop.eup %1778 }
0x1fea   :  { %v1187_v34 = vsel %vm111_vm3, %v1779_v37, %v1777_v50 }
0x1feb   :  { %v1193_v41 = vmul.f32 %v1191_v38, %v1187_v34  ;;  %v1188_v29 = vmul.f32 %v1187_v34, %v1120_v18 }
0x1fed   :  { %1195 = vrot.lane.b32.xlu0 %v1193_v41, %s1899_s3 }
0x205f   :  { %v1196_v43 = vpop.permute.xlu0 %1195 }
0x2060   :  { %v1198_v44 = vadd.f32 %v1196_v43, %v1188_v29  ;;  %v1474_v43 = vld [vmem:[%s2386_s8] ss:$0 sm:$0xff] }
0x2062   :  { %1780 = vtanh.f32 %v1198_v44 }
0x206c   :  { %v1781_v45 = vpop.eup %1780 }
0x206d   :  { %1201 = vrot.lane.b32.xlu1 %v1781_v45, %s1900_s14 }
0x2071   :  { %1268 = vrot.lane.b32.xlu1 %v1187_v34, %s1900_s14 }
0x20df   :  { %v1202_v46 = vpop.permute.xlu1 %1201 }
0x20e0   :  { %v2293_v47 = vmul.f32 %v1202_v46, %v1187_v34 }
0x20e2   :  { %v1211_v48 = vpack.c.bf16 %v2293_v47, %v2293_v47 }
0x20e3   :  { %v1269_v61 = vpop.permute.xlu1 %1268 }
0x20e4   :  { %1213 = vrot.lane.b32.xlu0 %v1211_v48, %s1900_s14 }
0x2156   :  { %v1214_v49 = vpop.permute.xlu0 %1213 }
0x2157   :  { %1641 = vmatmul.mubr.msk.bf16.vlgmr.msra.gmra.mrb[28].mxu0 %vm203_vm4, %v1214_v49 }
0x2158   :  { %1656 = vmatprep.mubr.msk.bf16.mxu0 %vm1898_vm0, %v1897_v0  ;;  %1653 = vmatpush3.bf16.msra.mxu0 %v99_v31 }
0x2159   :  { %1654 = vmatprep.subr.bf16.mxu0 %v1897_v0 }
0x222a   :  { %v1252_v51 = vpop.f32.mrb[28].mxu0 }
0x222b   :  { %v1253_v53 = vadd.f32 %v2196_v39, %v1252_v51  ;;  %v1642_v54 = vpop.f32.mrb[29].mxu0 }
0x222c   :  { %v1255_v55 = vpop.f32.mrb[30].mxu0 }
0x222d   :  { %v1471_v56 = vmul.f32 -1.442695, %v1253_v53  ;;  %v1643_v57 = vpop.f32.mrb[31].mxu0 }
0x222f   :  { %1782 = vpow2.f32 %v1471_v56 }
0x2230   :  { %1784 = vtanh.f32 %v1253_v53 }
0x2239   :  { %v1783_v58 = vpop.eup %1782 }
0x223a   :  { %v1261_v30 = vadd.f32 1.0, %v1783_v58  ;;  %v1785_v59 = vpop.eup %1784 }
0x223c   :  { %1786 = vrcp.f32 %v1261_v30 }
0x2246   :  { %v1787_v35 = vpop.eup %1786 }
0x2247   :  { %v1265_v62 = vsel %vm111_vm3, %v1787_v35, %v1785_v59 }
0x2248   :  { %v1271_v63 = vmul.f32 %v1269_v61, %v1265_v62  ;;  %v1266_v2 = vmul.f32 %v1265_v62, %v1198_v44 }
0x224a   :  { %1273 = vrot.lane.b32.xlu0 %v1271_v63, %s1899_s3 }
0x22bc   :  { %v1274_v3 = vpop.permute.xlu0 %1273 }
0x22bd   :  { %v1276_v4 = vadd.f32 %v1274_v3, %v1266_v2 }
0x22bf   :  { %1788 = vtanh.f32 %v1276_v4 }
0x22c9   :  { %v1789_v5 = vpop.eup %1788 }
0x22ca   :  { %1279 = vrot.lane.b32.xlu1 %v1789_v5, %s1900_s14 }
0x22ce   :  { %1346 = vrot.lane.b32.xlu1 %v1265_v62, %s1900_s14 }
0x233c   :  { %v1280_v6 = vpop.permute.xlu1 %1279 }
0x233d   :  { %v1282_v7 = vmul.f32 %v1280_v6, %v1265_v62 }
0x233f   :  { %v1289_v8 = vpack.c.bf16 %v1282_v7, %v1282_v7 }
0x2340   :  { %v1347_v19 = vpop.permute.xlu1 %1346 }
0x2341   :  { %1291 = vrot.lane.b32.xlu0 %v1289_v8, %s1900_s14 }
0x23b3   :  { %v1292_v9 = vpop.permute.xlu0 %1291 }
0x23b4   :  { %1649 = vmatmul.mubr.msk.bf16.vlgmr.msra.gmra.mrb[28].mxu1 %vm203_vm4, %v1292_v9 }
0x2487   :  { %v1330_v10 = vpop.f32.mrb[28].mxu1 }
0x2488   :  { %v1331_v11 = vadd.f32 %v2196_v39, %v1330_v10  ;;  %v1650_v12 = vpop.f32.mrb[29].mxu1 }
0x2489   :  { %v1333_v13 = vpop.f32.mrb[30].mxu1 }
0x248a   :  { %v1473_v14 = vmul.f32 -1.442695, %v1331_v11  ;;  %v1651_v15 = vpop.f32.mrb[31].mxu1 }
0x248c   :  { %1790 = vpow2.f32 %v1473_v14 }
0x248d   :  { %1792 = vtanh.f32 %v1331_v11 }
0x2496   :  { %v1791_v33 = vpop.eup %1790 }
0x2497   :  { %v1339_v36 = vadd.f32 1.0, %v1791_v33  ;;  %v1793_v17 = vpop.eup %1792 }
0x2499   :  { %1794 = vrcp.f32 %v1339_v36 }
0x24a3   :  { %v1795_v18 = vpop.eup %1794 }
0x24a4   :  { %v1343_v20 = vsel %vm111_vm3, %v1795_v18, %v1793_v17 }
0x24a5   :  { %v1349_v22 = vmul.f32 %v1347_v19, %v1343_v20  ;;  %v1344_v39 = vmul.f32 %v1343_v20, %v1276_v4 }
0x24a7   :  { %1351 = vrot.lane.b32.xlu0 %v1349_v22, %s1899_s3 }
0x24ab   :  { %814 = vrot.lane.b32.xlu0 %v2204_v60, %s1900_s14 }
0x24af   :  { %972 = vrot.lane.b32.xlu0 %v2240_v42, %s1900_s14 }
0x24b3   :  { %1128 = vrot.lane.b32.xlu0 %v2276_v21, %s1900_s14 }
0x24b7   :  { %1284 = vrot.lane.b32.xlu0 %v1282_v7, %s1900_s14 }
0x2519   :  { %v1352_v23 = vpop.permute.xlu0 %1351 }
0x251a   :  { %v1354_v24 = vadd.f32 %v1352_v23, %v1344_v39 }
0x251c   :  { %1796 = vtanh.f32 %v1354_v24 }
0x251d   :  { %v815_v40 = vpop.permute.xlu0 %814 }
0x251e   :  { %818 = vst.msk [vmem:[#allocation2] sm:$0x1] %vm817_vm5, %v815_v40 }
0x251f   :  { %820 = vst.msk [vmem:[#allocation2 + $0x7] sm:$0x2] %vm819_vm6, %v815_v40 }
0x2521   :  { %v973_v60 = vpop.permute.xlu0 %972 }
0x2522   :  { %975 = vst.msk [vmem:[#allocation2 + $0x2] sm:$0x1] %vm817_vm5, %v973_v60 }
0x2523   :  { %976 = vst.msk [vmem:[#allocation2 + $0x9] sm:$0x2] %vm819_vm6, %v973_v60 }
0x2525   :  { %v1129_v42 = vpop.permute.xlu0 %1128 }
0x2526   :  { %v1797_v21 = vpop.eup %1796  ;;  %1131 = vst.msk [vmem:[#allocation2 + $0x4] sm:$0x1] %vm817_vm5, %v1129_v42 }
0x2527   :  { %1132 = vst.msk [vmem:[#allocation2 + $0xb] sm:$0x2] %vm819_vm6, %v1129_v42  ;;  %1357 = vrot.lane.b32.xlu1 %v1797_v21, %s1900_s14 }
0x2529   :  { %v1285_v25 = vpop.permute.xlu0 %1284 }
0x252a   :  { %1287 = vst.msk [vmem:[#allocation2 + $0x6] sm:$0x1] %vm817_vm5, %v1285_v25 }
0x252b   :  { %1288 = vst.msk [vmem:[#allocation2 + $0xd] sm:$0x2] %vm819_vm6, %v1285_v25  ;;  %894 = vrot.lane.b32.xlu1 %v2222_v16, %s1900_s14  ;;  %v98_v16 = vld [vmem:[%s2385_s7 + $0x18] sm:$0xff] }
0x252f   :  { %1050 = vrot.lane.b32.xlu1 %v2258_v1, %s1900_s14  ;;  %v100_v1 = vpack.c.bf16 %v98_v16, %v97_v28 }
0x2531   :  { %1655 = vmatpush3.bf16.msra.mxu0 %v100_v1 }
0x2533   :  { %1206 = vrot.lane.b32.xlu1 %v2293_v47, %s1900_s14 }
0x2599   :  { %v1358_v32 = vpop.permute.xlu1 %1357 }
0x259a   :  { %v1360_v52 = vmul.f32 %v1358_v32, %v1343_v20 }
0x259c   :  { %1362 = vrot.lane.b32.xlu1 %v1360_v52, %s1900_s14 }
0x259d   :  { %v895_v50 = vpop.permute.xlu1 %894 }
0x259e   :  { %897 = vst.msk [vmem:[#allocation2 + $0x1] sm:$0x1] %vm817_vm5, %v895_v50 }
0x259f   :  { %898 = vst.msk [vmem:[#allocation2 + $0x8] sm:$0x2] %vm819_vm6, %v895_v50 }
0x25a1   :  { %v1051_v37 = vpop.permute.xlu1 %1050 }
0x25a2   :  { %1053 = vst.msk [vmem:[#allocation2 + $0x3] sm:$0x1] %vm817_vm5, %v1051_v37 }
0x25a3   :  { %1054 = vst.msk [vmem:[#allocation2 + $0xa] sm:$0x2] %vm819_vm6, %v1051_v37 }
0x25a5   :  { %v1207_v38 = vpop.permute.xlu1 %1206 }
0x25a6   :  { %1209 = vst.msk [vmem:[#allocation2 + $0x5] sm:$0x1] %vm817_vm5, %v1207_v38 }
0x25a7   :  { %1210 = vst.msk [vmem:[#allocation2 + $0xc] sm:$0x2] %vm819_vm6, %v1207_v38 }
0x260e   :  { %v1363_v0 = vpop.permute.xlu1 %1362 }
0x260f   :  { %1365 = vst.msk [vmem:[#allocation2 + $0x7] sm:$0x1] %vm817_vm5, %v1363_v0 }
0x2610   :  { %1366 = vst.msk [vmem:[#allocation2 + $0xe] sm:$0x2] %vm819_vm6, %v1363_v0 }
0x2616   :  { %v1367_v34 = vld [vmem:[#allocation2] sm:$0xff] }
0x2617   :  { %v1368_v41 = vld [vmem:[#allocation2 + $0x8] sm:$0xff] }
0x2618   :  { %v1369_v29 = vpack.c.bf16 %v1368_v41, %v1367_v34 }
0x261a   :  { %1657 = vmatmul.mubr.msk.bf16.vlgmr.msra.gmra.mrb[32].mxu0 %vm203_vm4, %v1369_v29 }
0x26ed   :  { %v1413_v44 = vpop.f32.mrb[32].mxu0 }
0x26ee   :  { %v1414_v45 = vadd.f32 %v1474_v43, %v1413_v44  ;;  %v1658_v46 = vpop.f32.mrb[33].mxu0 }
0x26ef   :  { %v1416_v47 = vpop.f32.mrb[34].mxu0 }
0x26f0   :  { %1420 = vst.msk [vmem:[#allocation9] sm:$0xff] %vm125_vm1, %v1414_v45  ;;  %v1417_v48 = vadd.f32 %v1474_v43, %v1416_v47  ;;  %v1659_v49 = vpop.f32.mrb[35].mxu0 }
0x26f2   :  { %1421 = vst.msk [vmem:[#allocation9 + $0x8] sm:$0xff] %vm125_vm1, %v1417_v48 }
0x26f3   :  { %1875 = shalt.err (!%p1872_p0)
}
0x26f4   :  { %s1876_s1 = scalar_lea.hbm %s2387_s9, 256 }
0x26f5   :  { %p1877_p1 = scmp.ne.s32.totalorder %s2387_s9, %s1876_s1  ;;  %p1880_p2 = scmp.lt.u32.totalorder %s1876_s1, %s2387_s9 }
0x26f7   :  { %p1882_p3 = pnand %p1880_p2, %p1877_p1 }
0x26f9   :  { %1885 = shalt.err (!%p1882_p3)
}
0x26fa   :  { %1433 = dma.vmem_to_hbm [thread:$0]  %s1428_s30, 256, %s2387_s9, [#allocation5], %s1894_s21, %s1894_s21, %s1895_s22  }
0x26fb   :  { %1890 = dma.done.wait [#allocation5], 256  }
0x26fc   :  { %1891 = vsyncadd [#allocation5], 4294967040 }
0x26fd   :  { %1437 = vsyncpa [#allocation4], 1 }
0x26fe   :  { %1438 = vsyncpa [#allocation7], 1 }
0x26ff   :  { %1439 = vsyncpa [#allocation5], 1 }

</bundles_post_ra>
